<compile_context>
chip_gen: v5e
topology: v5e:2x2
jax: 0.10.0
libtpu: 0.0.40
codegen_flags: <defaults>
</compile_context>

<pallas_src>
import jax
import jax.numpy as jnp
from jax.experimental import pallas as pl
from jax.experimental.pallas import tpu as pltpu


# ----------------------------------------------------------------------------
# Fused kernel: conv1/2/3 (+ReLU+MaxPool) -> fc1 -> ReLU -> fc2 -> ReLU -> fc3
# One grid step processes one batch tile of TB elements.
# ----------------------------------------------------------------------------
def cnn_fused_kernel(
    x_ref,                      # (TB, L, 5)     f32, channels-last
    wc1_ref, bc1_ref,           # (15, 64)  bf16, (1, 64)  f32
    wc2_ref, bc2_ref,           # (192,128) bf16, (1, 128) f32
    wc3_ref, bc3_ref,           # (384,256) bf16, (1, 256) f32
    wf1_ref, bf1_ref,           # (Lp,256,128) bf16, (1, 128) f32
    wf2_ref, bf2_ref,           # (128, 64) bf16, (1, 64)  f32
    wf3_ref, bf3_ref,           # (64, 4)   bf16, (1, 4)   f32
    o_ref,                      # (TB, 4)   f32
):
    def conv_relu_pool(x3, w_ref, b_ref):
        # x3: (TB, L, Cin) f32 -> (TB, L//2, Cout) f32
        TB, L, Cin = x3.shape
        Cout = w_ref.shape[-1]
        zcol = jnp.zeros((TB, 1, Cin), x3.dtype)
        left = jnp.concatenate([zcol, x3[:, : L - 1, :]], axis=1)    # x[t-1]
        right = jnp.concatenate([x3[:, 1:, :], zcol], axis=1)        # x[t+1]
        # lane-contiguous tap stack: [x[t-1] | x[t] | x[t+1]]
        xcat = jnp.concatenate([left, x3, right], axis=-1)           # (TB, L, 3*Cin)
        y = jnp.dot(
            xcat.reshape(TB * L, 3 * Cin).astype(jnp.bfloat16),
            w_ref[...],
            preferred_element_type=jnp.float32,
        )                                                            # (TB*L, Cout) f32
        y = jnp.maximum(y + b_ref[...], 0.0)                         # bias + ReLU
        # MaxPool1d(kernel_size=2): pair adjacent rows (never crosses batch
        # boundaries because L is even).
        y = jnp.max(y.reshape(TB * L // 2, 2, Cout), axis=1)         # (TB*L/2, Cout)
        return y.reshape(TB, L // 2, Cout)

    h = conv_relu_pool(x_ref[...], wc1_ref, bc1_ref)                 # (TB, L/2,  64)
    h = conv_relu_pool(h, wc2_ref, bc2_ref)                          # (TB, L/4, 128)
    h = conv_relu_pool(h, wc3_ref, bc3_ref)                          # (TB, Lp,  256)

    # fc1 without the flatten transpose: accumulate over the Lp time slices.
    TB, Lp, _ = h.shape
    H1 = bf1_ref.shape[-1]
    acc = jnp.zeros((TB, H1), jnp.float32)
    for l in range(Lp):                                              # static, tiny
        acc = acc + jnp.dot(
            h[:, l, :].astype(jnp.bfloat16), wf1_ref[l],
            preferred_element_type=jnp.float32,
        )
    h = jnp.maximum(acc + bf1_ref[...], 0.0)                         # (TB, 128)

    h = jnp.dot(h.astype(jnp.bfloat16), wf2_ref[...],
                preferred_element_type=jnp.float32)
    h = jnp.maximum(h + bf2_ref[...], 0.0)                           # (TB, 64)

    o = jnp.dot(h.astype(jnp.bfloat16), wf3_ref[...],
                preferred_element_type=jnp.float32) + bf3_ref[...]   # (TB, 4)

    o_ref[...] = o.astype(o_ref.dtype)


# ----------------------------------------------------------------------------
# Wrapper
# ----------------------------------------------------------------------------
def _pick_batch_tile(B):
    """Largest legal batch tile: whole batch if small, else a multiple-of-8
    divisor of B (keeps the (8,128) rule on the output block)."""
    if B <= 256:
        return B
    best = None
    for cand in range(8, 257, 8):
        if B % cand == 0:
            best = cand
    return best if best is not None else B


def cnn_forward(params, x_ncl):
    """x_ncl: (B, 5, prior_duration) in PyTorch NCL layout. Returns (B, 4)."""
    B, Cin, L = x_ncl.shape
    assert Cin == 5
    assert L % 8 == 0, "prior_duration must be divisible by 8"

    TB = _pick_batch_tile(B)
    num_tiles = B // TB

    x = jnp.transpose(x_ncl, (0, 2, 1))                              # (B, L, Cin)

    const2 = lambda i: (0, 0)
    const3 = lambda i: (0, 0, 0)

    out = pl.pallas_call(
        cnn_fused_kernel,
        out_shape=jax.ShapeDtypeStruct((B, 4), x.dtype),
        grid=(num_tiles,),
        in_specs=[
            pl.BlockSpec((TB, L, Cin), lambda i: (i, 0, 0)),
            pl.BlockSpec(params["w_c1"].shape, const2),
            pl.BlockSpec(params["b_c1"].shape, const2),
            pl.BlockSpec(params["w_c2"].shape, const2),
            pl.BlockSpec(params["b_c2"].shape, const2),
            pl.BlockSpec(params["w_c3"].shape, const2),
            pl.BlockSpec(params["b_c3"].shape, const2),
            pl.BlockSpec(params["w_f1"].shape, const3),
            pl.BlockSpec(params["b_f1"].shape, const2),
            pl.BlockSpec(params["w_f2"].shape, const2),
            pl.BlockSpec(params["b_f2"].shape, const2),
            pl.BlockSpec(params["w_f3"].shape, const2),
            pl.BlockSpec(params["b_f3"].shape, const2),
        ],
        out_specs=pl.BlockSpec((TB, 4), lambda i: (i, 0)),
        compiler_params=pltpu.CompilerParams(
            dimension_semantics=("parallel",),   # v7x: split batch tiles over 2 TCs
        ),
    )(
        x,
        params["w_c1"], params["b_c1"],
        params["w_c2"], params["b_c2"],
        params["w_c3"], params["b_c3"],
        params["w_f1"], params["b_f1"],
        params["w_f2"], params["b_f2"],
        params["w_f3"], params["b_f3"],
    )
    return out


# ----------------------------------------------------------------------------
# Parameter init (deterministic, xavier-normal style), converted ONCE to the
# kernel-friendly layouts (stacked-tap conv weights, fc1 row permutation, bf16).
# ----------------------------------------------------------------------------
def xavier_normal(key, shape, fan_in, fan_out, dtype=jnp.float32):
    std = (2.0 / (fan_in + fan_out)) ** 0.5
    return std * jax.random.normal(key, shape, dtype=dtype)


def init_params(key, prior_duration, w_dtype=jnp.bfloat16):
    assert prior_duration % 8 == 0
    Lp = prior_duration // 8
    ks = jax.random.split(key, 6)

    def conv_w(k, cin, cout):
        # torch Conv1d weight layout (cout, cin, K=3) -> stacked-tap (3*cin, cout)
        # with row index k*cin + ci  (tap k multiplies x[t + k - 1]).
        w = xavier_normal(k, (cout, cin, 3), fan_in=cin * 3, fan_out=cout * 3)
        return jnp.transpose(w, (2, 1, 0)).reshape(3 * cin, cout).astype(w_dtype)

    def fc_w(k, fin, fout):
        # torch Linear weight layout (fout, fin) -> (fin, fout)
        w = xavier_normal(k, (fout, fin), fan_in=fin, fan_out=fout)
        return jnp.transpose(w)

    # fc1: torch flatten order has feature index f = c*Lp + l. Permute rows once
    # into (Lp, 256, 128) so the kernel never transposes the conv3 output.
    w_f1_torch = fc_w(ks[3], 256 * Lp, 128)                          # (256*Lp, 128)
    w_f1 = w_f1_torch.reshape(256, Lp, 128).transpose(1, 0, 2).astype(w_dtype)

    return {
        "w_c1": conv_w(ks[0], 5, 64),     "b_c1": jnp.zeros((1, 64), jnp.float32),
        "w_c2": conv_w(ks[1], 64, 128),   "b_c2": jnp.zeros((1, 128), jnp.float32),
        "w_c3": conv_w(ks[2], 128, 256),  "b_c3": jnp.zeros((1, 256), jnp.float32),
        "w_f1": w_f1,                     "b_f1": jnp.zeros((1, 128), jnp.float32),
        "w_f2": fc_w(ks[4], 128, 64).astype(w_dtype),
        "b_f2": jnp.zeros((1, 64), jnp.float32),
        "w_f3": fc_w(ks[5], 64, 4).astype(w_dtype),
        "b_f3": jnp.zeros((1, 4), jnp.float32),
    }


if __name__ == "__main__":
    # config: prior_duration=16 (divisible by 8); dropout is eval-mode identity.
    PRIOR_DURATION = 16
    BATCH = 2

    key = jax.random.PRNGKey(0)
    k_params, k_x = jax.random.split(key)

    params = init_params(k_params, PRIOR_DURATION)
    x = jax.random.normal(k_x, (BATCH, 5, PRIOR_DURATION), dtype=jnp.float32)

    fwd = jax.jit(cnn_forward)
    out = jax.block_until_ready(fwd(params, x))
    assert out.shape == (BATCH, 4)
    print("KERNEL_OK")
</pallas_src>

<mosaic_0001>
module attributes {stable_mosaic.version = 11 : i64} {
  func.func @cnn_fused_kernel(%arg0: i32, %arg1: memref<2x16x5xf32, #tpu.memory_space<vmem>>, %arg2: memref<15x64xbf16, #tpu.memory_space<vmem>>, %arg3: memref<1x64xf32, #tpu.memory_space<vmem>>, %arg4: memref<192x128xbf16, #tpu.memory_space<vmem>>, %arg5: memref<1x128xf32, #tpu.memory_space<vmem>>, %arg6: memref<384x256xbf16, #tpu.memory_space<vmem>>, %arg7: memref<1x256xf32, #tpu.memory_space<vmem>>, %arg8: memref<2x256x128xbf16, #tpu.memory_space<vmem>>, %arg9: memref<1x128xf32, #tpu.memory_space<vmem>>, %arg10: memref<128x64xbf16, #tpu.memory_space<vmem>>, %arg11: memref<1x64xf32, #tpu.memory_space<vmem>>, %arg12: memref<64x4xbf16, #tpu.memory_space<vmem>>, %arg13: memref<1x4xf32, #tpu.memory_space<vmem>>, %arg14: memref<2x4xf32, #tpu.memory_space<vmem>>) attributes {dimension_semantics = [#tpu.dimension_semantics<parallel>], iteration_bounds = array<i64: 1>, scalar_prefetch = 0 : i64, scratch_operands = 0 : i64, tpu.core_type = #tpu.core_type<tc>, window_params = [{transform_indices = @transform_0, window_bounds = array<i64: 2, 16, 5>}, {pipeline_mode = #tpu.pipeline_mode<synchronous>, transform_indices = @transform_1, window_bounds = array<i64: 15, 64>}, {pipeline_mode = #tpu.pipeline_mode<synchronous>, transform_indices = @transform_2, window_bounds = array<i64: 1, 64>}, {pipeline_mode = #tpu.pipeline_mode<synchronous>, transform_indices = @transform_3, window_bounds = array<i64: 192, 128>}, {pipeline_mode = #tpu.pipeline_mode<synchronous>, transform_indices = @transform_4, window_bounds = array<i64: 1, 128>}, {pipeline_mode = #tpu.pipeline_mode<synchronous>, transform_indices = @transform_5, window_bounds = array<i64: 384, 256>}, {pipeline_mode = #tpu.pipeline_mode<synchronous>, transform_indices = @transform_6, window_bounds = array<i64: 1, 256>}, {pipeline_mode = #tpu.pipeline_mode<synchronous>, transform_indices = @transform_7, window_bounds = array<i64: 2, 256, 128>}, {pipeline_mode = #tpu.pipeline_mode<synchronous>, transform_indices = @transform_8, window_bounds = array<i64: 1, 128>}, {pipeline_mode = #tpu.pipeline_mode<synchronous>, transform_indices = @transform_9, window_bounds = array<i64: 128, 64>}, {pipeline_mode = #tpu.pipeline_mode<synchronous>, transform_indices = @transform_10, window_bounds = array<i64: 1, 64>}, {pipeline_mode = #tpu.pipeline_mode<synchronous>, transform_indices = @transform_11, window_bounds = array<i64: 64, 4>}, {pipeline_mode = #tpu.pipeline_mode<synchronous>, transform_indices = @transform_12, window_bounds = array<i64: 1, 4>}, {transform_indices = @transform_13, window_bounds = array<i64: 2, 4>}]} {
    %c0 = arith.constant 0 : index
    %c0_0 = arith.constant 0 : index
    %c0_1 = arith.constant 0 : index
    %0 = vector.load %arg1[%c0, %c0_0, %c0_1] : memref<2x16x5xf32, #tpu.memory_space<vmem>>, vector<2x16x5xf32>
    %cst = arith.constant 0.000000e+00 : f32
    %1 = vector.broadcast %cst : f32 to vector<2x1x5xf32>
    %2 = vector.extract_strided_slice %0 {offsets = [0, 0, 0], sizes = [2, 15, 5], strides = [1, 1, 1]} : vector<2x16x5xf32> to vector<2x15x5xf32>
    %3 = tpu.concatenate %1, %2 in 1 : vector<2x1x5xf32>, vector<2x15x5xf32> -> vector<2x16x5xf32>
    %4 = vector.extract_strided_slice %0 {offsets = [0, 1, 0], sizes = [2, 15, 5], strides = [1, 1, 1]} : vector<2x16x5xf32> to vector<2x15x5xf32>
    %5 = tpu.concatenate %4, %1 in 1 : vector<2x15x5xf32>, vector<2x1x5xf32> -> vector<2x16x5xf32>
    %6 = tpu.concatenate %3, %0, %5 in 2 : vector<2x16x5xf32>, vector<2x16x5xf32>, vector<2x16x5xf32> -> vector<2x16x15xf32>
    %7 = vector.shape_cast %6 : vector<2x16x15xf32> to vector<32x15xf32>
    %8 = arith.truncf %7 : vector<32x15xf32> to vector<32x15xbf16>
    %c0_2 = arith.constant 0 : index
    %c0_3 = arith.constant 0 : index
    %9 = vector.load %arg2[%c0_2, %c0_3] : memref<15x64xbf16, #tpu.memory_space<vmem>>, vector<15x64xbf16>
    %cst_4 = arith.constant dense<0.000000e+00> : vector<32x64xf32>
    %10 = tpu.matmul %8, %9, %cst_4 {dimension_numbers = #tpu.dot_dimension_numbers<[1], [0], [0], [1], [0, 0, 1, 1], [], []>} : vector<32x15xbf16>, vector<15x64xbf16>, vector<32x64xf32> -> vector<32x64xf32>
    %c0_5 = arith.constant 0 : index
    %c0_6 = arith.constant 0 : index
    %11 = vector.load %arg3[%c0_5, %c0_6] : memref<1x64xf32, #tpu.memory_space<vmem>>, vector<1x64xf32>
    %12 = vector.broadcast %11 : vector<1x64xf32> to vector<32x64xf32>
    %13 = arith.addf %10, %12 : vector<32x64xf32>
    %cst_7 = arith.constant 0.000000e+00 : f32
    %14 = vector.broadcast %cst_7 : f32 to vector<32x64xf32>
    %15 = arith.maximumf %13, %14 : vector<32x64xf32>
    %16 = vector.shape_cast %15 : vector<32x64xf32> to vector<16x2x64xf32>
    %cst_8 = arith.constant dense<0xFF800000> : vector<16x64xf32>
    %17 = vector.multi_reduction <maximumf>, %16, %cst_8 [1] : vector<16x2x64xf32> to vector<16x64xf32>
    %18 = vector.shape_cast %17 : vector<16x64xf32> to vector<2x8x64xf32>
    %cst_9 = arith.constant 0.000000e+00 : f32
    %19 = vector.broadcast %cst_9 : f32 to vector<2x1x64xf32>
    %20 = vector.extract_strided_slice %18 {offsets = [0, 0, 0], sizes = [2, 7, 64], strides = [1, 1, 1]} : vector<2x8x64xf32> to vector<2x7x64xf32>
    %21 = tpu.concatenate %19, %20 in 1 : vector<2x1x64xf32>, vector<2x7x64xf32> -> vector<2x8x64xf32>
    %22 = vector.extract_strided_slice %18 {offsets = [0, 1, 0], sizes = [2, 7, 64], strides = [1, 1, 1]} : vector<2x8x64xf32> to vector<2x7x64xf32>
    %23 = tpu.concatenate %22, %19 in 1 : vector<2x7x64xf32>, vector<2x1x64xf32> -> vector<2x8x64xf32>
    %24 = tpu.concatenate %21, %18, %23 in 2 : vector<2x8x64xf32>, vector<2x8x64xf32>, vector<2x8x64xf32> -> vector<2x8x192xf32>
    %25 = vector.shape_cast %24 : vector<2x8x192xf32> to vector<16x192xf32>
    %26 = arith.truncf %25 : vector<16x192xf32> to vector<16x192xbf16>
    %c0_10 = arith.constant 0 : index
    %c0_11 = arith.constant 0 : index
    %27 = vector.load %arg4[%c0_10, %c0_11] : memref<192x128xbf16, #tpu.memory_space<vmem>>, vector<192x128xbf16>
    %cst_12 = arith.constant dense<0.000000e+00> : vector<16x128xf32>
    %28 = tpu.matmul %26, %27, %cst_12 {dimension_numbers = #tpu.dot_dimension_numbers<[1], [0], [0], [1], [0, 0, 1, 1], [], []>} : vector<16x192xbf16>, vector<192x128xbf16>, vector<16x128xf32> -> vector<16x128xf32>
    %c0_13 = arith.constant 0 : index
    %c0_14 = arith.constant 0 : index
    %29 = vector.load %arg5[%c0_13, %c0_14] : memref<1x128xf32, #tpu.memory_space<vmem>>, vector<1x128xf32>
    %30 = vector.broadcast %29 : vector<1x128xf32> to vector<16x128xf32>
    %31 = arith.addf %28, %30 : vector<16x128xf32>
    %cst_15 = arith.constant 0.000000e+00 : f32
    %32 = vector.broadcast %cst_15 : f32 to vector<16x128xf32>
    %33 = arith.maximumf %31, %32 : vector<16x128xf32>
    %34 = vector.shape_cast %33 : vector<16x128xf32> to vector<8x2x128xf32>
    %cst_16 = arith.constant dense<0xFF800000> : vector<8x128xf32>
    %35 = vector.multi_reduction <maximumf>, %34, %cst_16 [1] : vector<8x2x128xf32> to vector<8x128xf32>
    %36 = vector.shape_cast %35 : vector<8x128xf32> to vector<2x4x128xf32>
    %cst_17 = arith.constant 0.000000e+00 : f32
    %37 = vector.broadcast %cst_17 : f32 to vector<2x1x128xf32>
    %38 = vector.extract_strided_slice %36 {offsets = [0, 0, 0], sizes = [2, 3, 128], strides = [1, 1, 1]} : vector<2x4x128xf32> to vector<2x3x128xf32>
    %39 = tpu.concatenate %37, %38 in 1 : vector<2x1x128xf32>, vector<2x3x128xf32> -> vector<2x4x128xf32>
    %40 = vector.extract_strided_slice %36 {offsets = [0, 1, 0], sizes = [2, 3, 128], strides = [1, 1, 1]} : vector<2x4x128xf32> to vector<2x3x128xf32>
    %41 = tpu.concatenate %40, %37 in 1 : vector<2x3x128xf32>, vector<2x1x128xf32> -> vector<2x4x128xf32>
    %42 = tpu.concatenate %39, %36, %41 in 2 : vector<2x4x128xf32>, vector<2x4x128xf32>, vector<2x4x128xf32> -> vector<2x4x384xf32>
    %43 = vector.shape_cast %42 : vector<2x4x384xf32> to vector<8x384xf32>
    %44 = arith.truncf %43 : vector<8x384xf32> to vector<8x384xbf16>
    %c0_18 = arith.constant 0 : index
    %c0_19 = arith.constant 0 : index
    %45 = vector.load %arg6[%c0_18, %c0_19] : memref<384x256xbf16, #tpu.memory_space<vmem>>, vector<384x256xbf16>
    %cst_20 = arith.constant dense<0.000000e+00> : vector<8x256xf32>
    %46 = tpu.matmul %44, %45, %cst_20 {dimension_numbers = #tpu.dot_dimension_numbers<[1], [0], [0], [1], [0, 0, 1, 1], [], []>} : vector<8x384xbf16>, vector<384x256xbf16>, vector<8x256xf32> -> vector<8x256xf32>
    %c0_21 = arith.constant 0 : index
    %c0_22 = arith.constant 0 : index
    %47 = vector.load %arg7[%c0_21, %c0_22] : memref<1x256xf32, #tpu.memory_space<vmem>>, vector<1x256xf32>
    %48 = vector.broadcast %47 : vector<1x256xf32> to vector<8x256xf32>
    %49 = arith.addf %46, %48 : vector<8x256xf32>
    %cst_23 = arith.constant 0.000000e+00 : f32
    %50 = vector.broadcast %cst_23 : f32 to vector<8x256xf32>
    %51 = arith.maximumf %49, %50 : vector<8x256xf32>
    %52 = vector.shape_cast %51 : vector<8x256xf32> to vector<4x2x256xf32>
    %cst_24 = arith.constant dense<0xFF800000> : vector<4x256xf32>
    %53 = vector.multi_reduction <maximumf>, %52, %cst_24 [1] : vector<4x2x256xf32> to vector<4x256xf32>
    %54 = vector.shape_cast %53 : vector<4x256xf32> to vector<2x2x256xf32>
    %cst_25 = arith.constant 0.000000e+00 : f32
    %55 = vector.broadcast %cst_25 : f32 to vector<2x128xf32>
    %56 = vector.extract_strided_slice %54 {offsets = [0, 0, 0], sizes = [2, 1, 256], strides = [1, 1, 1]} : vector<2x2x256xf32> to vector<2x1x256xf32>
    %57 = vector.shape_cast %56 : vector<2x1x256xf32> to vector<2x256xf32>
    %58 = arith.truncf %57 : vector<2x256xf32> to vector<2x256xbf16>
    %c0_26 = arith.constant 0 : index
    %c0_27 = arith.constant 0 : index
    %c0_28 = arith.constant 0 : index
    %59 = vector.load %arg8[%c0_26, %c0_27, %c0_28] : memref<2x256x128xbf16, #tpu.memory_space<vmem>>, vector<1x256x128xbf16>
    %60 = vector.shape_cast %59 : vector<1x256x128xbf16> to vector<256x128xbf16>
    %cst_29 = arith.constant dense<0.000000e+00> : vector<2x128xf32>
    %61 = tpu.matmul %58, %60, %cst_29 {dimension_numbers = #tpu.dot_dimension_numbers<[1], [0], [0], [1], [0, 0, 1, 1], [], []>} : vector<2x256xbf16>, vector<256x128xbf16>, vector<2x128xf32> -> vector<2x128xf32>
    %62 = arith.addf %55, %61 : vector<2x128xf32>
    %63 = vector.extract_strided_slice %54 {offsets = [0, 1, 0], sizes = [2, 1, 256], strides = [1, 1, 1]} : vector<2x2x256xf32> to vector<2x1x256xf32>
    %64 = vector.shape_cast %63 : vector<2x1x256xf32> to vector<2x256xf32>
    %65 = arith.truncf %64 : vector<2x256xf32> to vector<2x256xbf16>
    %c1 = arith.constant 1 : index
    %c0_30 = arith.constant 0 : index
    %c0_31 = arith.constant 0 : index
    %66 = vector.load %arg8[%c1, %c0_30, %c0_31] : memref<2x256x128xbf16, #tpu.memory_space<vmem>>, vector<1x256x128xbf16>
    %67 = vector.shape_cast %66 : vector<1x256x128xbf16> to vector<256x128xbf16>
    %cst_32 = arith.constant dense<0.000000e+00> : vector<2x128xf32>
    %68 = tpu.matmul %65, %67, %cst_32 {dimension_numbers = #tpu.dot_dimension_numbers<[1], [0], [0], [1], [0, 0, 1, 1], [], []>} : vector<2x256xbf16>, vector<256x128xbf16>, vector<2x128xf32> -> vector<2x128xf32>
    %69 = arith.addf %62, %68 : vector<2x128xf32>
    %c0_33 = arith.constant 0 : index
    %c0_34 = arith.constant 0 : index
    %70 = vector.load %arg9[%c0_33, %c0_34] : memref<1x128xf32, #tpu.memory_space<vmem>>, vector<1x128xf32>
    %71 = vector.broadcast %70 : vector<1x128xf32> to vector<2x128xf32>
    %72 = arith.addf %69, %71 : vector<2x128xf32>
    %cst_35 = arith.constant 0.000000e+00 : f32
    %73 = vector.broadcast %cst_35 : f32 to vector<2x128xf32>
    %74 = arith.maximumf %72, %73 : vector<2x128xf32>
    %75 = arith.truncf %74 : vector<2x128xf32> to vector<2x128xbf16>
    %c0_36 = arith.constant 0 : index
    %c0_37 = arith.constant 0 : index
    %76 = vector.load %arg10[%c0_36, %c0_37] : memref<128x64xbf16, #tpu.memory_space<vmem>>, vector<128x64xbf16>
    %cst_38 = arith.constant dense<0.000000e+00> : vector<2x64xf32>
    %77 = tpu.matmul %75, %76, %cst_38 {dimension_numbers = #tpu.dot_dimension_numbers<[1], [0], [0], [1], [0, 0, 1, 1], [], []>} : vector<2x128xbf16>, vector<128x64xbf16>, vector<2x64xf32> -> vector<2x64xf32>
    %c0_39 = arith.constant 0 : index
    %c0_40 = arith.constant 0 : index
    %78 = vector.load %arg11[%c0_39, %c0_40] : memref<1x64xf32, #tpu.memory_space<vmem>>, vector<1x64xf32>
    %79 = vector.broadcast %78 : vector<1x64xf32> to vector<2x64xf32>
    %80 = arith.addf %77, %79 : vector<2x64xf32>
    %cst_41 = arith.constant 0.000000e+00 : f32
    %81 = vector.broadcast %cst_41 : f32 to vector<2x64xf32>
    %82 = arith.maximumf %80, %81 : vector<2x64xf32>
    %83 = arith.truncf %82 : vector<2x64xf32> to vector<2x64xbf16>
    %c0_42 = arith.constant 0 : index
    %c0_43 = arith.constant 0 : index
    %84 = vector.load %arg12[%c0_42, %c0_43] : memref<64x4xbf16, #tpu.memory_space<vmem>>, vector<64x4xbf16>
    %cst_44 = arith.constant dense<0.000000e+00> : vector<2x4xf32>
    %85 = tpu.matmul %83, %84, %cst_44 {dimension_numbers = #tpu.dot_dimension_numbers<[1], [0], [0], [1], [0, 0, 1, 1], [], []>} : vector<2x64xbf16>, vector<64x4xbf16>, vector<2x4xf32> -> vector<2x4xf32>
    %c0_45 = arith.constant 0 : index
    %c0_46 = arith.constant 0 : index
    %86 = vector.load %arg13[%c0_45, %c0_46] : memref<1x4xf32, #tpu.memory_space<vmem>>, vector<1x4xf32>
    %87 = vector.broadcast %86 : vector<1x4xf32> to vector<2x4xf32>
    %88 = arith.addf %85, %87 : vector<2x4xf32>
    %c0_47 = arith.constant 0 : index
    %c0_48 = arith.constant 0 : index
    %89 = vector.load %arg14[%c0_47, %c0_48] : memref<2x4xf32, #tpu.memory_space<vmem>>, vector<2x4xf32>
    tpu.vector_store %arg14[%c0_47, %c0_48], %88 {strides = array<i32>} : memref<2x4xf32, #tpu.memory_space<vmem>>, vector<2x4xf32>,
    return
  }
  func.func @transform_0(%arg0: i32) -> (i32, i32, i32) {
    %c0_i32 = arith.constant 0 : i32
    %c0_i32_0 = arith.constant 0 : i32
    %c0_i32_1 = arith.constant 0 : i32
    return %arg0, %c0_i32, %c0_i32_0 : i32, i32, i32
  }
  func.func @transform_1(%arg0: i32) -> (i32, i32) {
    %c0_i32 = arith.constant 0 : i32
    %c0_i32_0 = arith.constant 0 : i32
    %c0_i32_1 = arith.constant 0 : i32
    return %c0_i32, %c0_i32_0 : i32, i32
  }
  func.func @transform_2(%arg0: i32) -> (i32, i32) {
    %c0_i32 = arith.constant 0 : i32
    %c0_i32_0 = arith.constant 0 : i32
    %c0_i32_1 = arith.constant 0 : i32
    return %c0_i32, %c0_i32_0 : i32, i32
  }
  func.func @transform_3(%arg0: i32) -> (i32, i32) {
    %c0_i32 = arith.constant 0 : i32
    %c0_i32_0 = arith.constant 0 : i32
    %c0_i32_1 = arith.constant 0 : i32
    return %c0_i32, %c0_i32_0 : i32, i32
  }
  func.func @transform_4(%arg0: i32) -> (i32, i32) {
    %c0_i32 = arith.constant 0 : i32
    %c0_i32_0 = arith.constant 0 : i32
    %c0_i32_1 = arith.constant 0 : i32
    return %c0_i32, %c0_i32_0 : i32, i32
  }
  func.func @transform_5(%arg0: i32) -> (i32, i32) {
    %c0_i32 = arith.constant 0 : i32
    %c0_i32_0 = arith.constant 0 : i32
    %c0_i32_1 = arith.constant 0 : i32
    return %c0_i32, %c0_i32_0 : i32, i32
  }
  func.func @transform_6(%arg0: i32) -> (i32, i32) {
    %c0_i32 = arith.constant 0 : i32
    %c0_i32_0 = arith.constant 0 : i32
    %c0_i32_1 = arith.constant 0 : i32
    return %c0_i32, %c0_i32_0 : i32, i32
  }
  func.func @transform_7(%arg0: i32) -> (i32, i32, i32) {
    %c0_i32 = arith.constant 0 : i32
    %c0_i32_0 = arith.constant 0 : i32
    %c0_i32_1 = arith.constant 0 : i32
    %c0_i32_2 = arith.constant 0 : i32
    return %c0_i32, %c0_i32_0, %c0_i32_1 : i32, i32, i32
  }
  func.func @transform_8(%arg0: i32) -> (i32, i32) {
    %c0_i32 = arith.constant 0 : i32
    %c0_i32_0 = arith.constant 0 : i32
    %c0_i32_1 = arith.constant 0 : i32
    return %c0_i32, %c0_i32_0 : i32, i32
  }
  func.func @transform_9(%arg0: i32) -> (i32, i32) {
    %c0_i32 = arith.constant 0 : i32
    %c0_i32_0 = arith.constant 0 : i32
    %c0_i32_1 = arith.constant 0 : i32
    return %c0_i32, %c0_i32_0 : i32, i32
  }
  func.func @transform_10(%arg0: i32) -> (i32, i32) {
    %c0_i32 = arith.constant 0 : i32
    %c0_i32_0 = arith.constant 0 : i32
    %c0_i32_1 = arith.constant 0 : i32
    return %c0_i32, %c0_i32_0 : i32, i32
  }
  func.func @transform_11(%arg0: i32) -> (i32, i32) {
    %c0_i32 = arith.constant 0 : i32
    %c0_i32_0 = arith.constant 0 : i32
    %c0_i32_1 = arith.constant 0 : i32
    return %c0_i32, %c0_i32_0 : i32, i32
  }
  func.func @transform_12(%arg0: i32) -> (i32, i32) {
    %c0_i32 = arith.constant 0 : i32
    %c0_i32_0 = arith.constant 0 : i32
    %c0_i32_1 = arith.constant 0 : i32
    return %c0_i32, %c0_i32_0 : i32, i32
  }
  func.func @transform_13(%arg0: i32) -> (i32, i32) {
    %c0_i32 = arith.constant 0 : i32
    %c0_i32_0 = arith.constant 0 : i32
    return %arg0, %c0_i32 : i32, i32
  }
}

</mosaic_0001>

<bundles_post_ra>
// kernel: cnn_forward.1
= control target key start
LH: loop header
LB: loop body
LE: loop exit
PB: predicated region body
PF: predicated region fallthrough
CT: control target
= control target key end

     0   :  { %18 = vsyncpa [#allocation3], 0  ;;  %s2643_s0 = inlined_call_operand.vmem [shape: f32[2,16,5], index: 0, kind: input, shape index: {}]   ;;  %s2644_s1 = inlined_call_operand.vmem [shape: bf16[15,64], index: 1, kind: input, shape index: {}]   ;;  %s2645_s2 = inlined_call_operand.vmem [shape: f32[1,64], index: 2, kind: input, shape index: {}]   ;;  %s2646_s3 = inlined_call_operand.vmem [shape: bf16[192,128], index: 3, kind: input, shape index: {}]   ;;  %s2647_s4 = inlined_call_operand.vmem [shape: f32[1,128], index: 4, kind: input, shape index: {}]   ;;  %s2648_s5 = inlined_call_operand.hbm [shape: bf16[384,256], index: 5, kind: input, shape index: {}]   ;;  %s2649_s6 = inlined_call_operand.vmem [shape: f32[1,256], index: 6, kind: input, shape index: {}]   ;;  %s2650_s7 = inlined_call_operand.hbm [shape: bf16[2,256,128], index: 7, kind: input, shape index: {}]   ;;  %s2651_s8 = inlined_call_operand.vmem [shape: f32[1,128], index: 8, kind: input, shape index: {}]   ;;  %s2652_s9 = inlined_call_operand.vmem [shape: bf16[128,64], index: 9, kind: input, shape index: {}]   ;;  %s2653_s10 = inlined_call_operand.vmem [shape: f32[1,64], index: 10, kind: input, shape index: {}]   ;;  %s2654_s11 = inlined_call_operand.vmem [shape: bf16[64,4], index: 11, kind: input, shape index: {}]   ;;  %s2655_s12 = inlined_call_operand.vmem [shape: f32[1,4], index: 12, kind: input, shape index: {}]   ;;  %s2656_s13 = inlined_call_operand.hbm [shape: f32[2,4], index: 13, kind: output, shape index: {}]  }
   0x1   :  { %19 = vsyncpa [#allocation6], 0 }
   0x2   :  { %20 = vsyncpa [#allocation4], 0  ;;  %s35_s27 = sshll.u32 %s2648_s5, 4  ;;  %s2294_s28 = smov [#allocation2]   ;;  %s36_s27 = int_to_ptr.hbm [resolvable:$true] %s35_s27 }
   0x3   :  { %s37_s29 = sshll.u32 %s2294_s28, 4  ;;  %s50_s15 = sshll.u32 %s2650_s7, 4  ;;  %s38_s29 = int_to_ptr.vmem [resolvable:$true] %s37_s29  ;;  %s51_s15 = int_to_ptr.hbm [resolvable:$true] %s50_s15 }
   0x4   :  { %s2295_s16 = smov 128   ;;  %s2296_s17 = smov 8  }
   0x5   :  { %43 = dma.hbm_to_vmem [thread:$0]  %s36_s27, 6144, %s38_s29, [#allocation3], %s2295_s16, %s2295_s16, %s2296_s17  }
   0x6   :  { %s2297_s18 = smov [#allocation5]   ;;  %s2298_s20 = smov 64  }
   0x7   :  { %s52_s19 = sshll.u32 %s2297_s18, 4  ;;  %s2299_s21 = smov 4   ;;  %s53_s19 = int_to_ptr.vmem [resolvable:$true] %s52_s19 }
   0x8   :  { %58 = dma.hbm_to_vmem [thread:$0]  %s51_s15, 4096, %s53_s19, [#allocation6], %s2298_s20, %s2298_s20, %s2299_s21  }
   0x9   :  { %2288 = dma.done.wait [#allocation3], 6144  }
   0xa   :  { %2289 = vsyncadd [#allocation3], 4294961152 }
   0xb   :  { %2290 = dma.done.wait [#allocation6], 4096  }
   0xc   :  { %2291 = vsyncadd [#allocation6], 4294963200  ;;  %v78_v0 = vld [vmem:[%s2643_s0] sm:$0xff]  ;;  %v79_v1 = vld [vmem:[%s2643_s0 + $0x8] sm:$0xff]  ;;  %vm99_vm0 = vcmask 1046528   ;;  %s2300_s28 = smov 5  }
   0xd   :  { %v80_v2 = vld [vmem:[%s2643_s0 + $0x10] sm:$0xff]  ;;  %v101_v3 = vrot.slane %v79_v1, 1  ;;  %v2186_v4 = vpack.i.bf16 %v79_v1, %v78_v0  ;;  %v81_v5 = vld [vmem:[%s2643_s0 + $0x18] sm:$0xff]  ;;  %v100_v6 = vrot.slane %v78_v0, 1  ;;  %s2301_s29 = smov 10   ;;  %v88_v16 = vrot.slane %v79_v1, 7 }
   0xe   :  { %v104_v7 = vrot.slane %v81_v5, 1  ;;  %v2196_v8 = vpack.i.bf16 %v81_v5, %v80_v2  ;;  %v103_v9 = vrot.slane %v80_v2, 1  ;;  %v87_v17 = vrot.slane %v78_v0, 7  ;;  %v2071_v21 = vld [vmem:[%s2644_s1] sm:$0xff]  ;;  %v2083_v54 = vld [vmem:[%s2646_s3 + $0x58] sm:$0xff]  ;;  %v2082_v61 = vld [vmem:[%s2646_s3 + $0x50] sm:$0xff] }
   0xf   :  { %2187 = vrot.lane.b32.xlu0 %v2186_v4, %s2300_s28  ;;  %v102_v10 = vsel %vm99_vm0, %v100_v6, %v101_v3  ;;  %v108_v11 = vsel %vm99_vm0, %v101_v3, 0.0  ;;  %vm86_vm1 = vcmask 1040384   ;;  %v91_v19 = vrot.slane %v81_v5, 7  ;;  %v2409_v51 = vld [vmem:[%s2645_s2] ss:$0 sm:$0xff]  ;;  %537 = vmatpush.bf16.msra.mxu2 %v2083_v54  ;;  %v2081_v6 = vld [vmem:[%s2646_s3 + $0x48] sm:$0xff] }
  0x10   :  { %2197 = vrot.lane.b32.xlu1 %v2196_v8, %s2300_s28  ;;  %v105_v12 = vsel %vm99_vm0, %v103_v9, %v104_v7  ;;  %v109_v13 = vsel %vm99_vm0, %v104_v7, 0.0  ;;  %v2191_v14 = vpack.i.bf16 %v108_v11, %v102_v10  ;;  %v89_v18 = vsel %vm86_vm1, %v87_v17, %v88_v16  ;;  %s2303_s21 = smov [#allocation7]   ;;  %s1636_s7 = sshll.u32 %s2656_s13, 4  ;;  %s1637_s7 = int_to_ptr.hbm [resolvable:$true] %s1636_s7 }
  0x11   :  { %v2201_v15 = vpack.i.bf16 %v109_v13, %v105_v12  ;;  %v90_v20 = vrot.slane %v80_v2, 7  ;;  %vm166_vm2 = vcmask 1047552   ;;  %v2302_v22 = vmov 65535   ;;  %s1634_s5 = sshll.u32 %s2303_s21, 4  ;;  %s1635_s5 = int_to_ptr.vmem [resolvable:$true] %s1634_s5 }
  0x12   :  { %v167_v23 = vsel %vm99_vm0, 4294967295, %v2302_v22  ;;  %v97_v34 = vsel %vm86_vm1, 0.0, %v87_v17  ;;  %vm136_vm3 = vcmask 39936   ;;  %vm141_vm4 = vcmask 80896   ;;  %v2080_v17 = vld [vmem:[%s2646_s3 + $0x40] sm:$0xff] }
  0x13   :  { %v168_v24 = vsel %vm166_vm2, %v167_v23, 0  ;;  %v92_v25 = vsel %vm86_vm1, %v90_v20, %v91_v19  ;;  %v98_v31 = vsel %vm86_vm1, 0.0, %v90_v20  ;;  %vm159_vm5 = vcmask 121856   ;;  %538 = vmatpush.bf16.msra.mxu2 %v2082_v61 }
  0x14   :  { %v170_v26 = vand.u32 %v2071_v21, %v168_v24  ;;  %vm223_vm6 = vcmask 517120   ;;  %vm374_vm7 = vcmask 1041409   ;;  %vm350_vm8 = vcmask 1042434  }
  0x15   :  { %vm352_vm9 = vcmask 1043459   ;;  %vm354_vm10 = vcmask 1044484   ;;  %vm356_vm11 = vcmask 1045509   ;;  %vm358_vm12 = vcmask 1046534  }
  0x16   :  { %179 = vmatpush.bf16.msra.mxu0 %v170_v26  ;;  %vm360_vm13 = vcmask 1047559   ;;  %vm411_vm14 = vcmask 523264   ;;  %vm563_vm15 = vcmask 1041408   ;;  %vm657_vm2 = vcmask 1043456  }
  0x17   :  { %2192 = vrot.lane.b32.xlu0 %v2191_v14, %s2301_s29  ;;  %539 = vmatpush.bf16.msra.mxu2 %v2081_v6 }
  0x18   :  { %2202 = vrot.lane.b32.xlu1 %v2201_v15, %s2301_s29 }
  0x1b   :  { %540 = vmatpush.bf16.msra.mxu2 %v2080_v17 }
  0x81   :  { %v2188_v27 = vpop.permute.xlu0 %2187 }
  0x82   :  { %v2198_v28 = vpop.permute.xlu1 %2197  ;;  %v2190_v32 = vunpack.i.h.bf16 %v2188_v27  ;;  %v2189_v33 = vunpack.i.l.bf16 %v2188_v27 }
  0x83   :  { %v2200_v29 = vunpack.i.h.bf16 %v2198_v28  ;;  %v2199_v30 = vunpack.i.l.bf16 %v2198_v28 }
  0x84   :  { %v137_v41 = vsel %vm136_vm3, %v97_v34, %v2189_v33  ;;  %v138_v42 = vsel %vm136_vm3, %v89_v18, %v2190_v32 }
  0x85   :  { %v139_v38 = vsel %vm136_vm3, %v98_v31, %v2199_v30  ;;  %v140_v39 = vsel %vm136_vm3, %v92_v25, %v2200_v29  ;;  %vm1057_vm3 = vcmask 1045508  }
  0x89   :  { %v2193_v35 = vpop.permute.xlu0 %2192 }
  0x8a   :  { %v2195_v36 = vunpack.i.h.bf16 %v2193_v35  ;;  %v2194_v37 = vunpack.i.l.bf16 %v2193_v35  ;;  %v2203_v40 = vpop.permute.xlu1 %2202 }
  0x8b   :  { %v2205_v43 = vunpack.i.h.bf16 %v2203_v40  ;;  %v2204_v44 = vunpack.i.l.bf16 %v2203_v40 }
  0x8c   :  { %v142_v45 = vsel %vm141_vm4, %v137_v41, %v2194_v37  ;;  %v143_v46 = vsel %vm141_vm4, %v138_v42, %v2195_v36 }
  0x8d   :  { %v146_v47 = vpack.c.bf16 %v143_v46, %v142_v45  ;;  %v144_v48 = vsel %vm141_vm4, %v139_v38, %v2204_v44  ;;  %v145_v49 = vsel %vm141_vm4, %v140_v39, %v2205_v43  ;;  %vm1060_vm4 = vcmask 1045504  }
  0x8e   :  { %v147_v50 = vpack.c.bf16 %v145_v49, %v144_v48 }
  0x8f   :  { %1651 = vmatmul.msk.bf16.vlgmr.msra.gmra.mxu0 %vm159_vm5, %v146_v47 }
  0x9f   :  { %1652 = vmatmul.msk.bf16.gmra.mxu0 %vm159_vm5, %v147_v50  ;;  %vm1627_vm5 = vcmask 25600  }
 0x10c   :  { %v181_v52 = vpop.f32.mrf.mxu0 }
 0x10d   :  { %v182_v53 = vadd.f32 %v2409_v51, %v181_v52 }
 0x10f   :  { %v191_v55 = vmax.f32 %v182_v53, 0.0  ;;  %v2079_v53 = vld [vmem:[%s2646_s3 + $0x38] sm:$0xff] }
 0x110   :  { %519 = vmatpush.bf16.msra.mxu1 %v2079_v53 }
 0x111   :  { %v199_v56 = vrot.slane %v191_v55, 2  ;;  %v200_v57 = vrot.slane %v191_v55, 4  ;;  %v201_v58 = vrot.slane %v191_v55, 6  ;;  %v224_v59 = vsel %vm223_vm6, %v191_v55, -inf }
 0x112   :  { %v225_v60 = vrot.slane %v224_v59, 4 }
 0x113   :  { %v231_v62 = vsel %vm223_vm6, %v199_v56, -inf  ;;  %v238_v63 = vsel %vm223_vm6, %v200_v57, -inf  ;;  %v245_v0 = vsel %vm223_vm6, %v201_v58, -inf }
 0x114   :  { %v226_v1 = vmax.f32 %v224_v59, %v225_v60  ;;  %v232_v2 = vrot.slane %v231_v62, 4  ;;  %v239_v3 = vrot.slane %v238_v63, 4  ;;  %v246_v4 = vrot.slane %v245_v0, 4  ;;  %v183_v5 = vpop.f32.mrf.mxu0 }
 0x115   :  { %v184_v7 = vadd.f32 %v2409_v51, %v183_v5 }
 0x116   :  { %v227_v8 = vrot.slane %v226_v1, 2  ;;  %v233_v9 = vmax.f32 %v231_v62, %v232_v2  ;;  %v240_v10 = vmax.f32 %v238_v63, %v239_v3  ;;  %v247_v11 = vmax.f32 %v245_v0, %v246_v4  ;;  %v2078_v62 = vld [vmem:[%s2646_s3 + $0x30] sm:$0xff] }
 0x117   :  { %v192_v12 = vmax.f32 %v184_v7, 0.0  ;;  %520 = vmatpush.bf16.msra.mxu1 %v2078_v62 }
 0x118   :  { %v228_v13 = vmax.f32 %v226_v1, %v227_v8  ;;  %v234_v14 = vrot.slane %v233_v9, 2  ;;  %v241_v15 = vrot.slane %v240_v10, 2  ;;  %v248_v16 = vrot.slane %v247_v11, 2 }
 0x119   :  { %v202_v18 = vrot.slane %v192_v12, 2  ;;  %v203_v19 = vrot.slane %v192_v12, 4  ;;  %v204_v20 = vrot.slane %v192_v12, 6  ;;  %v252_v21 = vsel %vm223_vm6, %v192_v12, -inf }
 0x11a   :  { %v229_v22 = vrot.slane %v228_v13, 1  ;;  %v235_v23 = vmax.f32 %v233_v9, %v234_v14  ;;  %v242_v24 = vmax.f32 %v240_v10, %v241_v15  ;;  %v249_v25 = vmax.f32 %v247_v11, %v248_v16 }
 0x11b   :  { %v253_v26 = vrot.slane %v252_v21, 4  ;;  %v259_v27 = vsel %vm223_vm6, %v202_v18, -inf  ;;  %v266_v28 = vsel %vm223_vm6, %v203_v19, -inf  ;;  %v273_v29 = vsel %vm223_vm6, %v204_v20, -inf }
 0x11c   :  { %v236_v30 = vrot.slane %v235_v23, 1  ;;  %v243_v31 = vrot.slane %v242_v24, 1  ;;  %v250_v32 = vrot.slane %v249_v25, 1  ;;  %v186_v33 = vpop.f32.mrf.mxu0  ;;  %v260_v35 = vrot.slane %v259_v27, 4 }
 0x11d   :  { %v254_v34 = vmax.f32 %v252_v21, %v253_v26  ;;  %v267_v36 = vrot.slane %v266_v28, 4  ;;  %v187_v37 = vadd.f32 %v2409_v51, %v186_v33  ;;  %v2434_v38 = vmax.f32 %v228_v13, %v229_v22 }
 0x11e   :  { %v274_v39 = vrot.slane %v273_v29, 4  ;;  %v261_v41 = vmax.f32 %v259_v27, %v260_v35  ;;  %v2436_v44 = vmax.f32 %v235_v23, %v236_v30  ;;  %v2438_v45 = vmax.f32 %v242_v24, %v243_v31 }
 0x11f   :  { %v255_v40 = vrot.slane %v254_v34, 2  ;;  %v193_v42 = vmax.f32 %v187_v37, 0.0  ;;  %v268_v43 = vmax.f32 %v266_v28, %v267_v36  ;;  %v2440_v46 = vmax.f32 %v249_v25, %v250_v32  ;;  %v2076_v32 = vld [vmem:[%s2646_s3 + $0x20] sm:$0xff] }
 0x120   :  { %v275_v47 = vmax.f32 %v273_v29, %v274_v39  ;;  %v262_v55 = vrot.slane %v261_v41, 2  ;;  %v391_v7 = vsel %vm374_vm7, %v2436_v44, %v2434_v38  ;;  %v375_v11 = vsel %vm374_vm7, %v2438_v45, %v2436_v44 }
 0x121   :  { %v256_v48 = vmax.f32 %v254_v34, %v255_v40  ;;  %v205_v49 = vrot.slane %v193_v42, 2  ;;  %v206_v50 = vrot.slane %v193_v42, 4  ;;  %v207_v52 = vrot.slane %v193_v42, 6 }
 0x122   :  { %v280_v54 = vsel %vm223_vm6, %v193_v42, -inf  ;;  %v269_v56 = vrot.slane %v268_v43, 2  ;;  %v276_v57 = vrot.slane %v275_v47, 2  ;;  %v263_v3 = vmax.f32 %v261_v41, %v262_v55 }
 0x123   :  { %v257_v58 = vrot.slane %v256_v48, 1  ;;  %v281_v59 = vrot.slane %v280_v54, 4  ;;  %v287_v60 = vsel %vm223_vm6, %v205_v49, -inf  ;;  %v294_v61 = vsel %vm223_vm6, %v206_v50, -inf }
 0x124   :  { %v288_v63 = vrot.slane %v287_v60, 4  ;;  %v295_v0 = vrot.slane %v294_v61, 4  ;;  %v301_v1 = vsel %vm223_vm6, %v207_v52, -inf  ;;  %v188_v2 = vpop.f32.mrf.mxu0  ;;  %v264_v15 = vrot.slane %v263_v3, 1 }
 0x125   :  { %v282_v4 = vmax.f32 %v280_v54, %v281_v59  ;;  %v302_v5 = vrot.slane %v301_v1, 4  ;;  %v189_v6 = vadd.f32 %v2409_v51, %v188_v2  ;;  %v2456_v10 = vmax.f32 %v256_v48, %v257_v58  ;;  %v2077_v51 = vld [vmem:[%s2646_s3 + $0x28] sm:$0xff]  ;;  %v2075_v54 = vld [vmem:[%s2646_s3 + $0x18] sm:$0xff] }
 0x126   :  { %v289_v8 = vmax.f32 %v287_v60, %v288_v63  ;;  %v296_v9 = vmax.f32 %v294_v61, %v295_v0  ;;  %v270_v18 = vmax.f32 %v268_v43, %v269_v56  ;;  %v277_v19 = vmax.f32 %v275_v47, %v276_v57  ;;  %521 = vmatpush.bf16.msra.mxu1 %v2077_v51 }
 0x127   :  { %v283_v12 = vrot.slane %v282_v4, 2  ;;  %v303_v13 = vmax.f32 %v301_v1, %v302_v5  ;;  %v194_v14 = vmax.f32 %v189_v6, 0.0  ;;  %v2470_v40 = vmax.f32 %v263_v3, %v264_v15 }
 0x128   :  { %v290_v16 = vrot.slane %v289_v8, 2  ;;  %v297_v17 = vrot.slane %v296_v9, 2  ;;  %v271_v41 = vrot.slane %v270_v18, 1  ;;  %v278_v52 = vrot.slane %v277_v19, 1 }
 0x129   :  { %v284_v20 = vmax.f32 %v282_v4, %v283_v12  ;;  %v304_v21 = vrot.slane %v303_v13, 2  ;;  %v208_v22 = vrot.slane %v194_v14, 2  ;;  %v209_v23 = vrot.slane %v194_v14, 4 }
 0x12a   :  { %v291_v24 = vmax.f32 %v289_v8, %v290_v16  ;;  %v298_v25 = vmax.f32 %v296_v9, %v297_v17  ;;  %v210_v26 = vrot.slane %v194_v14, 6  ;;  %v308_v27 = vsel %vm223_vm6, %v194_v14, -inf  ;;  %522 = vmatpush.bf16.msra.mxu1 %v2076_v32 }
 0x12b   :  { %v285_v28 = vrot.slane %v284_v20, 1  ;;  %v305_v29 = vmax.f32 %v303_v13, %v304_v21  ;;  %v309_v30 = vrot.slane %v308_v27, 4  ;;  %v315_v31 = vsel %vm223_vm6, %v208_v22, -inf }
 0x12c   :  { %v292_v33 = vrot.slane %v291_v24, 1  ;;  %v299_v34 = vrot.slane %v298_v25, 1  ;;  %v316_v35 = vrot.slane %v315_v31, 4  ;;  %v322_v36 = vsel %vm223_vm6, %v209_v23, -inf }
 0x12d   :  { %v310_v37 = vmax.f32 %v308_v27, %v309_v30  ;;  %v323_v39 = vrot.slane %v322_v36, 4  ;;  %v286_v42 = vmax.f32 %v284_v20, %v285_v28  ;;  %v306_v49 = vrot.slane %v305_v29, 1 }
 0x12e   :  { %v293_v43 = vmax.f32 %v291_v24, %v292_v33  ;;  %v2472_v47 = vmax.f32 %v298_v25, %v299_v34  ;;  %v317_v48 = vmax.f32 %v315_v31, %v316_v35  ;;  %v329_v56 = vsel %vm223_vm6, %v210_v26, -inf  ;;  %523 = vmatpush.bf16.msra.mxu1 %v2075_v54  ;;  %v2073_v24 = vld [vmem:[%s2646_s3 + $0x8] sm:$0xff] }
 0x12f   :  { %v311_v50 = vrot.slane %v310_v37, 2  ;;  %v324_v53 = vmax.f32 %v322_v36, %v323_v39  ;;  %v392_v57 = vsel %vm350_vm8, %v2438_v45, %v391_v7  ;;  %v272_v60 = vmax.f32 %v270_v18, %v271_v41  ;;  %v2074_v7 = vld [vmem:[%s2646_s3 + $0x10] sm:$0xff] }
 0x130   :  { %v318_v55 = vrot.slane %v317_v48, 2  ;;  %v398_v58 = vsel %vm374_vm7, %v293_v43, %v286_v42  ;;  %v330_v62 = vrot.slane %v329_v56, 4  ;;  %v393_v0 = vsel %vm352_vm9, %v2440_v46, %v392_v57 }
 0x131   :  { %v312_v59 = vmax.f32 %v310_v37, %v311_v50  ;;  %v325_v61 = vrot.slane %v324_v53, 2  ;;  %v399_v1 = vsel %vm350_vm8, %v2472_v47, %v398_v58  ;;  %v376_v2 = vsel %vm350_vm8, %v2440_v46, %v375_v11 }
 0x132   :  { %v319_v63 = vmax.f32 %v317_v48, %v318_v55  ;;  %v331_v5 = vmax.f32 %v329_v56, %v330_v62  ;;  %v394_v6 = vsel %vm354_vm10, %v2456_v10, %v393_v0  ;;  %v279_v8 = vmax.f32 %v277_v19, %v278_v52  ;;  %524 = vmatpush.bf16.msra.mxu1 %v2074_v7  ;;  %v2099_v0 = vld [vmem:[#allocation2 + $0x74] sm:$0xf0] }
 0x133   :  { %v313_v3 = vrot.slane %v312_v59, 1  ;;  %v326_v4 = vmax.f32 %v324_v53, %v325_v61  ;;  %v307_v9 = vmax.f32 %v305_v29, %v306_v49  ;;  %v377_v13 = vsel %vm352_vm9, %v2456_v10, %v376_v2 }
 0x134   :  { %v320_v12 = vrot.slane %v319_v63, 1  ;;  %v332_v11 = vrot.slane %v331_v5, 2  ;;  %v395_v51 = vsel %vm356_vm11, %v2470_v40, %v394_v6  ;;  %v378_v18 = vsel %vm354_vm10, %v2470_v40, %v377_v13  ;;  %v2097_v6 = vld [vmem:[#allocation2 + $0x64] sm:$0xf0]  ;;  %v2212_v13 = vld [vmem:[%s2647_s4] ss:$0 sm:$0xff] }
 0x135   :  { %v314_v14 = vmax.f32 %v312_v59, %v313_v3  ;;  %v327_v15 = vrot.slane %v326_v4, 1  ;;  %v400_v17 = vsel %vm352_vm9, %v307_v9, %v399_v1  ;;  %v381_v19 = vsel %vm374_vm7, %v2472_v47, %v293_v43  ;;  %v1824_v1 = vld [vmem:[#allocation2 + $0xf0] sm:$0xf]  ;;  %v2115_v3 = vld [vmem:[#allocation2 + $0xf4] sm:$0xf0] }
 0x136   :  { %v321_v16 = vmax.f32 %v319_v63, %v320_v12  ;;  %v333_v21 = vmax.f32 %v331_v5, %v332_v11  ;;  %v379_v23 = vsel %vm356_vm11, %v272_v60, %v378_v18  ;;  %v382_v26 = vsel %vm350_vm8, %v307_v9, %v381_v19  ;;  %525 = vmatpush.bf16.msra.mxu1 %v2073_v24  ;;  %v1760_v63 = vld [vmem:[#allocation2 + $0x70] sm:$0xf]  ;;  %v1752_v5 = vld [vmem:[#allocation2 + $0x60] sm:$0xf]  ;;  %v2131_v19 = vld [vmem:[#allocation2 + $0x174] sm:$0xf0] }
 0x137   :  { %v328_v20 = vmax.f32 %v326_v4, %v327_v15  ;;  %v401_v22 = vsel %vm354_vm10, %v314_v14, %v400_v17  ;;  %v351_v27 = vsel %vm350_vm8, %v2436_v44, %v2434_v38  ;;  %v396_v29 = vsel %vm358_vm12, %v272_v60, %v395_v51  ;;  %v2095_v15 = vld [vmem:[#allocation2 + $0x54] sm:$0xf0]  ;;  %v1808_v11 = vld [vmem:[#allocation2 + $0xd0] sm:$0xf]  ;;  %v1736_v24 = vld [vmem:[#allocation2 + $0x40] sm:$0xf] }
 0x138   :  { %v402_v25 = vsel %vm356_vm11, %v321_v16, %v401_v22  ;;  %v334_v28 = vrot.slane %v333_v21, 1  ;;  %v380_v30 = vsel %vm358_vm12, %v279_v8, %v379_v23  ;;  %v383_v31 = vsel %vm352_vm9, %v314_v14, %v382_v26  ;;  %v1888_v18 = vld [vmem:[#allocation2 + $0x170] sm:$0xf]  ;;  %v1800_v26 = vld [vmem:[#allocation2 + $0xc0] sm:$0xf] }
 0x139   :  { %v403_v32 = vsel %vm358_vm12, %v328_v20, %v402_v25  ;;  %v384_v33 = vsel %vm354_vm10, %v321_v16, %v383_v31  ;;  %v353_v34 = vsel %vm352_vm9, %v2438_v45, %v351_v27  ;;  %v362_v35 = vsel %vm350_vm8, %v293_v43, %v286_v42  ;;  %v2093_v25 = vld [vmem:[#allocation2 + $0x44] sm:$0xf0] }
 0x13a   :  { %v335_v36 = vmax.f32 %v333_v21, %v334_v28  ;;  %v385_v37 = vsel %vm356_vm11, %v328_v20, %v384_v33  ;;  %v355_v38 = vsel %vm354_vm10, %v2440_v46, %v353_v34  ;;  %v363_v44 = vsel %vm352_vm9, %v2472_v47, %v362_v35  ;;  %v2109_v28 = vld [vmem:[#allocation2 + $0xc4] sm:$0xf0]  ;;  %v1880_v34 = vld [vmem:[#allocation2 + $0x160] sm:$0xf] }
 0x13b   :  { %v397_v39 = vsel %vm360_vm13, %v279_v8, %v396_v29  ;;  %v389_v41 = vsel %vm99_vm0, %v380_v30, 0.0  ;;  %v357_v48 = vsel %vm356_vm11, %v2456_v10, %v355_v38  ;;  %v364_v45 = vsel %vm354_vm10, %v307_v9, %v363_v44  ;;  %v1816_v8 = vld [vmem:[#allocation2 + $0xe0] sm:$0xf]  ;;  %v2113_v9 = vld [vmem:[#allocation2 + $0xe4] sm:$0xf0] }
 0x13c   :  { %v404_v42 = vsel %vm360_vm13, %v335_v36, %v403_v32  ;;  %v386_v43 = vsel %vm358_vm12, %v335_v36, %v385_v37  ;;  %v359_v49 = vsel %vm358_vm12, %v2470_v40, %v357_v48  ;;  %v365_v46 = vsel %vm356_vm11, %v314_v14, %v364_v45  ;;  %v2072_v40 = vld [vmem:[%s2646_s3] sm:$0xff]  ;;  %v1744_v14 = vld [vmem:[#allocation2 + $0x50] sm:$0xf]  ;;  %v2098_v29 = vld [vmem:[#allocation2 + $0x74] sm:$0xf] }
 0x13d   :  { %v2206_v50 = vpack.i.bf16 %v404_v42, %v397_v39  ;;  %v390_v47 = vsel %vm99_vm0, %v386_v43, 0.0  ;;  %v361_v52 = vsel %vm360_vm13, %v272_v60, %v359_v49  ;;  %v366_v53 = vsel %vm358_vm12, %v321_v16, %v365_v46  ;;  %526 = vmatpush.bf16.msra.mxu1 %v2072_v40  ;;  %v2111_v16 = vld [vmem:[#allocation2 + $0xd4] sm:$0xf0]  ;;  %v1762_v30 = vld [vmem:[#allocation2 + $0x78] sm:$0xf0] }
 0x13e   :  { %v415_v54 = vpack.c.bf16 %v390_v47, %v389_v41  ;;  %v367_v10 = vsel %vm360_vm13, %v328_v20, %v366_v53  ;;  %v370_v58 = vsel %vm86_vm1, 0.0, %v361_v52  ;;  %v1761_v2 = vor.u32 %v2099_v0, %v1760_v63  ;;  %v2129_v35 = vld [vmem:[#allocation2 + $0x164] sm:$0xf0]  ;;  %v1728_v38 = vld [vmem:[#allocation2 + $0x30] sm:$0xf] }
 0x13f   :  { %2207 = vrot.lane.b32.xlu2 %v2206_v50, %s2298_s20  ;;  %v371_v59 = vsel %vm86_vm1, 0.0, %v367_v10  ;;  %v1825_v4 = vor.u32 %v2115_v3, %v1824_v1  ;;  %v1753_v7 = vor.u32 %v2097_v6, %v1752_v5  ;;  %v1817_v12 = vor.u32 %v2113_v9, %v1816_v8  ;;  %v2091_v44 = vld [vmem:[#allocation2 + $0x34] sm:$0xf0]  ;;  %v1792_v41 = vld [vmem:[#allocation2 + $0xb0] sm:$0xf] }
 0x140   :  { %1701 = vmatmul.msk.bf16.vlgmr.msra.gmra.mxu2 %vm411_vm14, %v415_v54  ;;  %970 = vmatpush.bf16.msra.mxu3 %v1761_v2  ;;  %v1745_v51 = vor.u32 %v2095_v15, %v1744_v14  ;;  %v1809_v17 = vor.u32 %v2111_v16, %v1808_v11  ;;  %v1889_v22 = vor.u32 %v2131_v19, %v1888_v18  ;;  %v2107_v48 = vld [vmem:[#allocation2 + $0xb4] sm:$0xf0]  ;;  %v2096_v45 = vld [vmem:[#allocation2 + $0x64] sm:$0xf]  ;;  %v1754_v50 = vld [vmem:[#allocation2 + $0x68] sm:$0xf0] }
 0x141   :  { %983 = vmatpush.bf16.msrb.mxu0 %v1825_v4  ;;  %v1737_v27 = vor.u32 %v2093_v25, %v1736_v24  ;;  %v1801_v32 = vor.u32 %v2109_v28, %v1800_v26  ;;  %v1765_v33 = vor.u32 %v2098_v29, %v1762_v30  ;;  %v1881_v36 = vor.u32 %v2129_v35, %v1880_v34  ;;  %v1872_v10 = vld [vmem:[#allocation2 + $0x150] sm:$0xf]  ;;  %v2127_v40 = vld [vmem:[#allocation2 + $0x154] sm:$0xf0]  ;;  %v2089_v1 = vld [vmem:[#allocation2 + $0x24] sm:$0xf0] }
 0x142   :  { %996 = vmatpush.bf16.msrb.mxu2 %v1889_v22  ;;  %v1729_v39 = vor.u32 %v2091_v44, %v1728_v38  ;;  %v1793_v53 = vor.u32 %v2107_v48, %v1792_v41  ;;  %v1757_v54 = vor.u32 %v2096_v45, %v1754_v50  ;;  %v1873_v3 = vor.u32 %v2127_v40, %v1872_v10  ;;  %v1784_v5 = vld [vmem:[#allocation2 + $0xa0] sm:$0xf]  ;;  %v2105_v6 = vld [vmem:[#allocation2 + $0xa4] sm:$0xf0]  ;;  %v1712_v38 = vld [vmem:[#allocation2 + $0x10] sm:$0xf] }
 0x143   :  { %1009 = vmatpush.bf16.msrb.mxu1 %v1765_v33  ;;  %vm642_vm0 = vcmask 1042432   ;;  %v1785_v11 = vor.u32 %v2105_v6, %v1784_v5  ;;  %v1864_v28 = vld [vmem:[#allocation2 + $0x140] sm:$0xf]  ;;  %v2125_v33 = vld [vmem:[#allocation2 + $0x144] sm:$0xf0] }
 0x144   :  { %971 = vmatpush.bf16.msra.mxu3 %v1753_v7  ;;  %v2094_v7 = vld [vmem:[#allocation2 + $0x54] sm:$0xf]  ;;  %v2087_v45 = vld [vmem:[#allocation2 + $0x14] sm:$0xf0]  ;;  %v2092_v40 = vld [vmem:[#allocation2 + $0x44] sm:$0xf] }
 0x145   :  { %984 = vmatpush.bf16.msrb.mxu0 %v1817_v12  ;;  %v2103_v10 = vld [vmem:[#allocation2 + $0x94] sm:$0xf0]  ;;  %v2101_v5 = vld [vmem:[#allocation2 + $0x84] sm:$0xf0] }
 0x146   :  { %997 = vmatpush.bf16.msrb.mxu2 %v1881_v36 }
 0x147   :  { %1010 = vmatpush.bf16.msrb.mxu1 %v1757_v54  ;;  %v1776_v54 = vld [vmem:[#allocation2 + $0x90] sm:$0xf] }
 0x148   :  { %972 = vmatpush.bf16.msra.mxu3 %v1745_v51 }
 0x149   :  { %985 = vmatpush.bf16.msrb.mxu0 %v1809_v17 }
 0x14a   :  { %998 = vmatpush.bf16.msrb.mxu2 %v1873_v3  ;;  %v2085_v3 = vld [vmem:[#allocation2 + $0x4] sm:$0xf0] }
 0x14c   :  { %973 = vmatpush.bf16.msra.mxu3 %v1737_v27 }
 0x14d   :  { %986 = vmatpush.bf16.msrb.mxu0 %v1801_v32 }
 0x150   :  { %974 = vmatpush.bf16.msra.mxu3 %v1729_v39 }
 0x151   :  { %987 = vmatpush.bf16.msrb.mxu0 %v1793_v53 }
 0x155   :  { %988 = vmatpush.bf16.msrb.mxu0 %v1785_v11 }
 0x199   :  { %v2208_v55 = vpop.permute.xlu2 %2207 }
 0x19a   :  { %v2210_v56 = vunpack.i.h.bf16 %v2208_v55  ;;  %v2209_v57 = vunpack.i.l.bf16 %v2208_v55 }
 0x19c   :  { %v412_v60 = vsel %vm411_vm14, %v370_v58, %v2209_v57  ;;  %v413_v61 = vsel %vm411_vm14, %v371_v59, %v2210_v56  ;;  %v1720_v59 = vld [vmem:[#allocation2 + $0x20] sm:$0xf] }
 0x19d   :  { %v414_v62 = vpack.c.bf16 %v413_v61, %v412_v60  ;;  %v1721_v4 = vor.u32 %v2089_v1, %v1720_v59  ;;  %v1738_v59 = vld [vmem:[#allocation2 + $0x48] sm:$0xf0] }
 0x19f   :  { %527 = vmatmul.bf16.vlgmr.msra.gmra.mxu1 %v414_v62  ;;  %975 = vmatpush.bf16.msra.mxu3 %v1721_v4  ;;  %v1768_v4 = vld [vmem:[#allocation2 + $0x80] sm:$0xf] }
 0x1c3   :  { %v542_v20 = vpop.f32.mrf.mxu2 }
 0x1cb   :  { %v544_v60 = vpop.f32.mrf.mxu2 }
 0x21c   :  { %v528_v21 = vpop.f32.mrf.mxu1 }
 0x21d   :  { %v529_v23 = vadd.f32 %v2212_v13, %v528_v21 }
 0x21f   :  { %v543_v31 = vadd.f32 %v542_v20, %v529_v23 }
 0x221   :  { %v547_v37 = vmax.f32 %v543_v31, 0.0 }
 0x223   :  { %v551_v42 = vrot.slane %v547_v37, 2  ;;  %v552_v43 = vrot.slane %v547_v37, 4  ;;  %v553_v49 = vrot.slane %v547_v37, 6  ;;  %v564_v46 = vsel %vm563_vm15, %v547_v37, -inf }
 0x224   :  { %v565_v47 = vrot.slane %v564_v46, 4  ;;  %v530_v52 = vpop.f32.mrf.mxu1 }
 0x225   :  { %v571_v55 = vsel %vm563_vm15, %v551_v42, -inf  ;;  %v578_v56 = vsel %vm563_vm15, %v552_v43, -inf  ;;  %v585_v57 = vsel %vm563_vm15, %v553_v49, -inf  ;;  %v531_v58 = vadd.f32 %v2212_v13, %v530_v52  ;;  %v1746_v13 = vld [vmem:[#allocation2 + $0x58] sm:$0xf0] }
 0x226   :  { %v566_v61 = vmax.f32 %v564_v46, %v565_v47  ;;  %v572_v62 = vrot.slane %v571_v55, 4  ;;  %v579_v63 = vrot.slane %v578_v56, 4  ;;  %v586_v0 = vrot.slane %v585_v57, 4 }
 0x227   :  { %v545_v2 = vadd.f32 %v544_v60, %v531_v58  ;;  %v1749_v51 = vor.u32 %v2094_v7, %v1746_v13  ;;  %v1865_v46 = vor.u32 %v2125_v33, %v1864_v28  ;;  %v1713_v58 = vor.u32 %v2087_v45, %v1712_v38  ;;  %v1856_v60 = vld [vmem:[#allocation2 + $0x130] sm:$0xf]  ;;  %v2114_v13 = vld [vmem:[#allocation2 + $0xf4] sm:$0xf]  ;;  %v1818_v33 = vld [vmem:[#allocation2 + $0xe8] sm:$0xf0] }
 0x228   :  { %v567_v8 = vrot.slane %v566_v61, 2  ;;  %v573_v9 = vmax.f32 %v571_v55, %v572_v62  ;;  %v580_v12 = vmax.f32 %v578_v56, %v579_v63  ;;  %v587_v14 = vmax.f32 %v585_v57, %v586_v0  ;;  %v1882_v38 = vld [vmem:[#allocation2 + $0x168] sm:$0xf0]  ;;  %v1840_v45 = vld [vmem:[#allocation2 + $0x110] sm:$0xf] }
 0x229   :  { %v548_v15 = vmax.f32 %v545_v2, 0.0  ;;  %1011 = vmatpush.bf16.msrb.mxu1 %v1749_v51  ;;  %999 = vmatpush.bf16.msrb.mxu2 %v1865_v46  ;;  %v1704_v2 = vld [vmem:[#allocation2] sm:$0xf] }
 0x22a   :  { %v568_v16 = vmax.f32 %v566_v61, %v567_v8  ;;  %v574_v17 = vrot.slane %v573_v9, 2  ;;  %v581_v18 = vrot.slane %v580_v12, 2  ;;  %v588_v19 = vrot.slane %v587_v14, 2  ;;  %v2123_v61 = vld [vmem:[#allocation2 + $0x134] sm:$0xf0]  ;;  %976 = vmatpush.bf16.msra.mxu3 %v1713_v58 }
 0x22b   :  { %v554_v20 = vrot.slane %v548_v15, 2  ;;  %v555_v21 = vrot.slane %v548_v15, 4  ;;  %v556_v22 = vrot.slane %v548_v15, 6  ;;  %v592_v23 = vsel %vm563_vm15, %v548_v15, -inf  ;;  %v1826_v15 = vld [vmem:[#allocation2 + $0xf8] sm:$0xf0] }
 0x22c   :  { %v569_v24 = vrot.slane %v568_v16, 1  ;;  %v575_v25 = vmax.f32 %v573_v9, %v574_v17  ;;  %v582_v26 = vmax.f32 %v580_v12, %v581_v18  ;;  %v589_v27 = vmax.f32 %v587_v14, %v588_v19  ;;  %v2090_v12 = vld [vmem:[#allocation2 + $0x34] sm:$0xf]  ;;  %v1730_v14 = vld [vmem:[#allocation2 + $0x38] sm:$0xf0] }
 0x22d   :  { %v593_v29 = vrot.slane %v592_v23, 4  ;;  %v599_v30 = vsel %vm563_vm15, %v554_v20, -inf  ;;  %v606_v31 = vsel %vm563_vm15, %v555_v21, -inf  ;;  %v613_v32 = vsel %vm563_vm15, %v556_v22, -inf  ;;  %v2130_v18 = vld [vmem:[#allocation2 + $0x174] sm:$0xf] }
 0x22e   :  { %v570_v34 = vmax.f32 %v568_v16, %v569_v24  ;;  %v576_v35 = vrot.slane %v575_v25, 1  ;;  %v583_v36 = vrot.slane %v582_v26, 1  ;;  %v590_v37 = vrot.slane %v589_v27, 1  ;;  %v1890_v19 = vld [vmem:[#allocation2 + $0x178] sm:$0xf0] }
 0x22f   :  { %v594_v44 = vmax.f32 %v592_v23, %v593_v29  ;;  %v600_v39 = vrot.slane %v599_v30, 4  ;;  %v607_v41 = vrot.slane %v606_v31, 4  ;;  %v614_v48 = vrot.slane %v613_v32, 4  ;;  %v1848_v20 = vld [vmem:[#allocation2 + $0x120] sm:$0xf] }
 0x230   :  { %v577_v42 = vmax.f32 %v575_v25, %v576_v35  ;;  %v584_v43 = vmax.f32 %v582_v26, %v583_v36  ;;  %v591_v49 = vmax.f32 %v589_v27, %v590_v37  ;;  %v1777_v22 = vor.u32 %v2103_v10, %v1776_v54  ;;  %v2121_v25 = vld [vmem:[#allocation2 + $0x124] sm:$0xf0]  ;;  %v2088_v26 = vld [vmem:[#allocation2 + $0x24] sm:$0xf]  ;;  %v1722_v27 = vld [vmem:[#allocation2 + $0x28] sm:$0xf0] }
 0x231   :  { %v595_v50 = vrot.slane %v594_v44, 2  ;;  %v601_v47 = vmax.f32 %v599_v30, %v600_v39  ;;  %v608_v52 = vmax.f32 %v606_v31, %v607_v41  ;;  %v615_v53 = vmax.f32 %v613_v32, %v614_v48  ;;  %v2112_v32 = vld [vmem:[#allocation2 + $0xe4] sm:$0xf] }
 0x232   :  { %v626_v55 = vsel %vm350_vm8, %v577_v42, %v570_v34  ;;  %v636_v56 = vsel %vm374_vm7, %v584_v43, %v577_v42  ;;  %v645_v57 = vsel %vm374_vm7, %v577_v42, %v570_v34  ;;  %v1741_v23 = vor.u32 %v2092_v40, %v1738_v59  ;;  %v2128_v34 = vld [vmem:[#allocation2 + $0x164] sm:$0xf]  ;;  %989 = vmatpush.bf16.msrb.mxu0 %v1777_v22  ;;  %v2119_v42 = vld [vmem:[#allocation2 + $0x114] sm:$0xf0]  ;;  %v1794_v22 = vld [vmem:[#allocation2 + $0xb8] sm:$0xf0] }
 0x233   :  { %v627_v62 = vsel %vm352_vm9, %v584_v43, %v626_v55  ;;  %v637_v63 = vsel %vm350_vm8, %v591_v49, %v636_v56  ;;  %v646_v0 = vsel %vm350_vm8, %v584_v43, %v645_v57  ;;  %v596_v1 = vmax.f32 %v594_v44, %v595_v50  ;;  %v2110_v56 = vld [vmem:[#allocation2 + $0xd4] sm:$0xf]  ;;  %v1810_v57 = vld [vmem:[#allocation2 + $0xd8] sm:$0xf0] }
 0x234   :  { %v632_v6 = vsel %vm86_vm1, 0.0, %v627_v62  ;;  %v643_v7 = vsel %vm642_vm0, %v637_v63, 0.0  ;;  %v647_v8 = vsel %vm352_vm9, %v591_v49, %v646_v0  ;;  %v602_v9 = vrot.slane %v601_v47, 2  ;;  %1012 = vmatpush.bf16.msrb.mxu1 %v1741_v23  ;;  %v1714_v62 = vld [vmem:[#allocation2 + $0x18] sm:$0xf0] }
 0x235   :  { %v655_v11 = vrot.slane %v647_v8, 4  ;;  %664 = vst [vmem:[#allocation1 + $0x10] ss:$2 sm:$0xff] %v643_v7  ;;  %v597_v51 = vrot.slane %v596_v1, 1  ;;  %v609_v16 = vrot.slane %v608_v52, 2  ;;  %v616_v17 = vrot.slane %v615_v53, 2 }
 0x236   :  { %v603_v21 = vmax.f32 %v601_v47, %v602_v9  ;;  %v1857_v24 = vor.u32 %v2123_v61, %v1856_v60  ;;  %v1705_v36 = vor.u32 %v2085_v3, %v1704_v2  ;;  %v1769_v37 = vor.u32 %v2101_v5, %v1768_v4  ;;  %v2086_v61 = vld [vmem:[#allocation2 + $0x14] sm:$0xf]  ;;  %v1874_v2 = vld [vmem:[#allocation2 + $0x158] sm:$0xf0]  ;;  %v1832_v3 = vld [vmem:[#allocation2 + $0x100] sm:$0xf] }
 0x237   :  { %v658_v28 = vsel %vm657_vm2, %v632_v6, %v655_v11  ;;  %v598_v29 = vmax.f32 %v596_v1, %v597_v51  ;;  %v610_v30 = vmax.f32 %v608_v52, %v609_v16  ;;  %v617_v31 = vmax.f32 %v615_v53, %v616_v17  ;;  %v2126_v63 = vld [vmem:[#allocation2 + $0x154] sm:$0xf]  ;;  %v2117_v4 = vld [vmem:[#allocation2 + $0x104] sm:$0xf0]  ;;  %v2108_v8 = vld [vmem:[#allocation2 + $0xc4] sm:$0xf] }
 0x238   :  { %660 = vst [vmem:[#allocation1] ss:$2 sm:$0xff] %v658_v28  ;;  %v604_v35 = vrot.slane %v603_v21, 1  ;;  %1000 = vmatpush.bf16.msrb.mxu2 %v1857_v24  ;;  %v1733_v41 = vor.u32 %v2090_v12, %v1730_v14  ;;  %v1829_v48 = vor.u32 %v2114_v13, %v1826_v15  ;;  %977 = vmatpush.bf16.msra.mxu3 %v1705_v36  ;;  %v1802_v14 = vld [vmem:[#allocation2 + $0xc8] sm:$0xf0] }
 0x239   :  { %v611_v44 = vrot.slane %v610_v30, 1  ;;  %v618_v39 = vrot.slane %v617_v31, 1  ;;  %v1893_v49 = vor.u32 %v2130_v18, %v1890_v19  ;;  %v1849_v46 = vor.u32 %v2121_v25, %v1848_v20  ;;  %990 = vmatpush.bf16.msrb.mxu0 %v1769_v37  ;;  %v2084_v51 = vld [vmem:[#allocation2 + $0x4] sm:$0xf]  ;;  %v1706_v16 = vld [vmem:[#allocation2 + $0x8] sm:$0xf0] }
 0x23a   :  { %v605_v43 = vmax.f32 %v603_v21, %v604_v35  ;;  %v1725_v50 = vor.u32 %v2088_v26, %v1722_v27  ;;  %v1821_v53 = vor.u32 %v2112_v32, %v1818_v33  ;;  %v1885_v54 = vor.u32 %v2128_v34, %v1882_v38  ;;  %1013 = vmatpush.bf16.msrb.mxu1 %v1733_v41  ;;  %v2124_v17 = vld [vmem:[#allocation2 + $0x144] sm:$0xf]  ;;  %v1866_v18 = vld [vmem:[#allocation2 + $0x148] sm:$0xf0]  ;;  %v2106_v21 = vld [vmem:[#allocation2 + $0xb4] sm:$0xf] }
 0x23b   :  { %v612_v47 = vmax.f32 %v610_v30, %v611_v44  ;;  %v619_v52 = vmax.f32 %v617_v31, %v618_v39  ;;  %v1841_v55 = vor.u32 %v2119_v42, %v1840_v45  ;;  %v1813_v7 = vor.u32 %v2110_v56, %v1810_v57  ;;  %v2122_v24 = vld [vmem:[#allocation2 + $0x134] sm:$0xf]  ;;  %v1858_v25 = vld [vmem:[#allocation2 + $0x138] sm:$0xf0]  ;;  %v1786_v30 = vld [vmem:[#allocation2 + $0xa8] sm:$0xf0] }
 0x23c   :  { %1022 = vmatpush.bf16.msrb.mxu3 %v1829_v48  ;;  %v628_v10 = vsel %vm350_vm8, %v605_v43, %v598_v29  ;;  %v648_v40 = vsel %vm374_vm7, %v605_v43, %v598_v29  ;;  %1001 = vmatpush.bf16.msrb.mxu2 %v1849_v46  ;;  %v1717_v12 = vor.u32 %v2086_v61, %v1714_v62  ;;  %v2104_v29 = vld [vmem:[#allocation2 + $0xa4] sm:$0xf]  ;;  %v1850_v37 = vld [vmem:[#allocation2 + $0x128] sm:$0xf0]  ;;  %v2102_v44 = vld [vmem:[#allocation2 + $0x94] sm:$0xf] }
 0x23d   :  { %v629_v58 = vsel %vm352_vm9, %v612_v47, %v628_v10  ;;  %v638_v59 = vsel %vm374_vm7, %v612_v47, %v605_v43  ;;  %v649_v60 = vsel %vm350_vm8, %v612_v47, %v648_v40  ;;  %1035 = vmatpush.bf16.msra.mxu0 %v1893_v49  ;;  %v1877_v15 = vor.u32 %v2126_v63, %v1874_v2  ;;  %v2120_v36 = vld [vmem:[#allocation2 + $0x124] sm:$0xf]  ;;  %v1778_v39 = vld [vmem:[#allocation2 + $0x98] sm:$0xf0]  ;;  %v2118_v48 = vld [vmem:[#allocation2 + $0x114] sm:$0xf] }
 0x23e   :  { %v639_v0 = vsel %vm350_vm8, %v619_v52, %v638_v59  ;;  %v650_v1 = vsel %vm352_vm9, %v619_v52, %v649_v60  ;;  %v633_v9 = vsel %vm86_vm1, 0.0, %v629_v58  ;;  %1014 = vmatpush.bf16.msrb.mxu1 %v1725_v50  ;;  %v1833_v11 = vor.u32 %v2117_v4, %v1832_v3  ;;  %v1842_v45 = vld [vmem:[#allocation2 + $0x118] sm:$0xf0]  ;;  %v2100_v43 = vld [vmem:[#allocation2 + $0x84] sm:$0xf]  ;;  %v2138_v59 = vld [vmem:[#allocation5 + $0x30] sm:$0xff] }
 0x23f   :  { %v644_v5 = vsel %vm642_vm0, %v639_v0, 0.0  ;;  %v656_v6 = vrot.slane %v650_v1, 4  ;;  %v1805_v19 = vor.u32 %v2108_v8, %v1802_v14  ;;  %v1709_v20 = vor.u32 %v2084_v51, %v1706_v16  ;;  %v1770_v49 = vld [vmem:[#allocation2 + $0x88] sm:$0xf0]  ;;  %v2116_v50 = vld [vmem:[#allocation2 + $0x104] sm:$0xf] }
 0x240   :  { %1023 = vmatpush.bf16.msrb.mxu3 %v1821_v53  ;;  %666 = vst [vmem:[#allocation1 + $0x11] ss:$2 sm:$0xff] %v644_v5  ;;  %1002 = vmatpush.bf16.msrb.mxu2 %v1841_v55  ;;  %v1869_v23 = vor.u32 %v2124_v17, %v1866_v18  ;;  %v1797_v27 = vor.u32 %v2106_v21, %v1794_v22  ;;  %v1834_v47 = vld [vmem:[#allocation2 + $0x108] sm:$0xf0]  ;;  %v2139_v40 = vld [vmem:[#allocation5 + $0x38] sm:$0xff]  ;;  %v2146_v60 = vld [vmem:[#allocation5 + $0x70] sm:$0xff] }
 0x241   :  { %v659_v13 = vsel %vm657_vm2, %v633_v9, %v656_v6  ;;  %1036 = vmatpush.bf16.msra.mxu0 %v1885_v54  ;;  %v1861_v33 = vor.u32 %v2122_v24, %v1858_v25  ;;  %v1789_v38 = vor.u32 %v2104_v29, %v1786_v30  ;;  %v1853_v41 = vor.u32 %v2120_v36, %v1850_v37  ;;  %v2147_v55 = vld [vmem:[#allocation5 + $0x78] sm:$0xff]  ;;  %v2154_v61 = vld [vmem:[#allocation5 + $0xb0] sm:$0xff]  ;;  %v2137_v1 = vld [vmem:[#allocation5 + $0x28] sm:$0xff] }
 0x242   :  { %662 = vst [vmem:[#allocation1 + $0x1] ss:$2 sm:$0xff] %v659_v13  ;;  %1015 = vmatpush.bf16.msrb.mxu1 %v1717_v12  ;;  %v1781_v42 = vor.u32 %v2102_v44, %v1778_v39  ;;  %v1845_v46 = vor.u32 %v2118_v48, %v1842_v45  ;;  %v1773_v52 = vor.u32 %v2100_v43, %v1770_v49  ;;  %v2155_v56 = vld [vmem:[#allocation5 + $0xb8] sm:$0xff]  ;;  %v2162_v62 = vld [vmem:[#allocation5 + $0xf0] sm:$0xff]  ;;  %v2145_v2 = vld [vmem:[#allocation5 + $0x68] sm:$0xff]  ;;  %vm1054_vm1 = vcmask 1043458  }
 0x243   :  { %v1837_v53 = vor.u32 %v2116_v50, %v1834_v47  ;;  %v2163_v57 = vld [vmem:[#allocation5 + $0xf8] sm:$0xff]  ;;  %v2153_v4 = vld [vmem:[#allocation5 + $0xa8] sm:$0xff]  ;;  %v2136_v8 = vld [vmem:[#allocation5 + $0x20] sm:$0xff] }
 0x244   :  { %1024 = vmatpush.bf16.msrb.mxu3 %v1813_v7  ;;  %1003 = vmatpush.bf16.msrb.mxu2 %v1833_v11  ;;  %v2161_v5 = vld [vmem:[#allocation5 + $0xe8] sm:$0xff]  ;;  %v724_v6 = vld [vmem:[%s2649_s6] sm:$0x3]  ;;  %v2144_v9 = vld [vmem:[#allocation5 + $0x60] sm:$0xff] }
 0x245   :  { %1037 = vmatpush.bf16.msra.mxu0 %v1877_v15  ;;  %v726_v12 = vperm.slane %v724_v6, 0  ;;  %v2152_v14 = vld [vmem:[#allocation5 + $0xa0] sm:$0xff]  ;;  %v2135_v51 = vld [vmem:[#allocation5 + $0x18] sm:$0xff]  ;;  %v727_v17 = vperm.slane %v724_v6, 1  ;;  %v2134_v21 = vld [vmem:[#allocation5 + $0x10] sm:$0xff] }
 0x246   :  { %1016 = vmatpush.bf16.msrb.mxu1 %v1709_v20  ;;  %v2160_v13 = vld [vmem:[#allocation5 + $0xe0] sm:$0xff]  ;;  %v2143_v16 = vld [vmem:[#allocation5 + $0x58] sm:$0xff]  ;;  %v2142_v22 = vld [vmem:[#allocation5 + $0x50] sm:$0xff] }
 0x247   :  { %v669_v26 = vld.sshfl [vmem:[#allocation1 + $0x10] sm:$0xff pattern:$0x75316420]  ;;  %v2159_v20 = vld [vmem:[#allocation5 + $0xd8] sm:$0xff]  ;;  %v2150_v25 = vld [vmem:[#allocation5 + $0x90] sm:$0xff] }
 0x248   :  { %1025 = vmatpush.bf16.msrb.mxu3 %v1805_v19  ;;  %v675_v28 = vpack.c.bf16 %v669_v26, %v669_v26  ;;  %1323 = vmatpush.bf16.msra.mxu2 %v2155_v56  ;;  %v2151_v19 = vld [vmem:[#allocation5 + $0x98] sm:$0xff]  ;;  %v2158_v26 = vld [vmem:[#allocation5 + $0xd0] sm:$0xff]  ;;  %v2133_v30 = vld [vmem:[#allocation5 + $0x8] sm:$0xff] }
 0x249   :  { %1038 = vmatpush.bf16.msra.mxu0 %v1869_v23  ;;  %v667_v31 = vld.sshfl [vmem:[#allocation1] sm:$0xff pattern:$0x75316420]  ;;  %v668_v32 = vld.sshfl [vmem:[#allocation1 + $0x8] sm:$0xff pattern:$0x75316420] }
 0x24a   :  { %1004 = vmatmul.bf16.vlgmr.msrb.gmra.mxu2 %v675_v28  ;;  %v673_v34 = vpack.c.bf16 %v667_v31, %v667_v31  ;;  %v674_v35 = vpack.c.bf16 %v668_v32, %v668_v32  ;;  %1336 = vmatpush.bf16.msra.mxu1 %v2163_v57  ;;  %v2141_v31 = vld [vmem:[#allocation5 + $0x48] sm:$0xff]  ;;  %v2132_v37 = vld [vmem:[#allocation5] sm:$0xff] }
 0x24b   :  { %v2156_v48 = vld [vmem:[#allocation5 + $0xc0] sm:$0xff] }
 0x24c   :  { %1026 = vmatpush.bf16.msrb.mxu3 %v1797_v27  ;;  %991 = vmatmul.bf16.vlgmr.msrb.gmra.mxu0 %v674_v35 }
 0x24d   :  { %978 = vmatmul.bf16.vlgmr.msra.gmra.mxu3 %v673_v34  ;;  %1017 = vmatmul.bf16.vlgmr.msrb.gmra.mxu1 %v673_v34  ;;  %v2149_v34 = vld [vmem:[#allocation5 + $0x88] sm:$0xff] }
 0x24e   :  { %1039 = vmatpush.bf16.msra.mxu0 %v1861_v33  ;;  %1324 = vmatpush.bf16.msra.mxu2 %v2154_v61 }
 0x24f   :  { %1337 = vmatpush.bf16.msra.mxu1 %v2162_v62 }
 0x250   :  { %1027 = vmatpush.bf16.msrb.mxu3 %v1789_v38  ;;  %v2140_v38 = vld [vmem:[#allocation5 + $0x40] sm:$0xff] }
 0x252   :  { %1040 = vmatpush.bf16.msra.mxu0 %v1853_v41  ;;  %1325 = vmatpush.bf16.msra.mxu2 %v2153_v4  ;;  %v2148_v41 = vld [vmem:[#allocation5 + $0x80] sm:$0xff] }
 0x253   :  { %1338 = vmatpush.bf16.msra.mxu1 %v2161_v5 }
 0x254   :  { %1028 = vmatpush.bf16.msrb.mxu3 %v1781_v42 }
 0x256   :  { %1041 = vmatpush.bf16.msra.mxu0 %v1845_v46  ;;  %1326 = vmatpush.bf16.msra.mxu2 %v2152_v14 }
 0x257   :  { %1339 = vmatpush.bf16.msra.mxu1 %v2160_v13 }
 0x258   :  { %1029 = vmatpush.bf16.msrb.mxu3 %v1773_v52 }
 0x25a   :  { %1042 = vmatpush.bf16.msra.mxu0 %v1837_v53  ;;  %1327 = vmatpush.bf16.msra.mxu2 %v2151_v19 }
 0x25b   :  { %1340 = vmatpush.bf16.msra.mxu1 %v2159_v20 }
 0x25c   :  { %1459 = vmatpush.bf16.msra.mxu3 %v2139_v40 }
 0x25d   :  { %1030 = vmatmul.bf16.vlgmr.msrb.gmra.mxu3 %v674_v35  ;;  %1043 = vmatmul.bf16.vlgmr.msra.gmra.mxu0 %v675_v28  ;;  %v2157_v35 = vld [vmem:[#allocation5 + $0xc8] sm:$0xff] }
 0x25e   :  { %1472 = vmatpush.bf16.msrb.mxu0 %v2147_v55  ;;  %1328 = vmatpush.bf16.msra.mxu2 %v2150_v25 }
 0x25f   :  { %1341 = vmatpush.bf16.msra.mxu1 %v2158_v26 }
 0x260   :  { %1460 = vmatpush.bf16.msra.mxu3 %v2138_v59 }
 0x262   :  { %1473 = vmatpush.bf16.msrb.mxu0 %v2146_v60  ;;  %1329 = vmatpush.bf16.msra.mxu2 %v2149_v34 }
 0x263   :  { %1342 = vmatpush.bf16.msra.mxu1 %v2157_v35 }
 0x264   :  { %1461 = vmatpush.bf16.msra.mxu3 %v2137_v1  ;;  %v2170_v1 = vld [vmem:[%s2652_s9 + $0x30] sm:$0xff] }
 0x266   :  { %1474 = vmatpush.bf16.msrb.mxu0 %v2145_v2  ;;  %1330 = vmatpush.bf16.msra.mxu2 %v2148_v41 }
 0x267   :  { %1343 = vmatpush.bf16.msra.mxu1 %v2156_v48 }
 0x268   :  { %1462 = vmatpush.bf16.msra.mxu3 %v2136_v8 }
 0x26a   :  { %1475 = vmatpush.bf16.msrb.mxu0 %v2144_v9 }
 0x26c   :  { %1463 = vmatpush.bf16.msra.mxu3 %v2135_v51 }
 0x26e   :  { %1476 = vmatpush.bf16.msrb.mxu0 %v2143_v16 }
 0x270   :  { %1464 = vmatpush.bf16.msra.mxu3 %v2134_v21 }
 0x272   :  { %1477 = vmatpush.bf16.msrb.mxu0 %v2142_v22 }
 0x274   :  { %1465 = vmatpush.bf16.msra.mxu3 %v2133_v30 }
 0x276   :  { %1478 = vmatpush.bf16.msrb.mxu0 %v2141_v31 }
 0x278   :  { %1466 = vmatpush.bf16.msra.mxu3 %v2132_v37 }
 0x27a   :  { %1479 = vmatpush.bf16.msrb.mxu0 %v2140_v38 }
 0x2c9   :  { %v992_v54 = vpop.f32.mrf.mxu0 }
 0x2ca   :  { %v1018_v10 = vpop.f32.mrf.mxu1 }
 0x2cb   :  { %v1019_v23 = vadd.f32 %v1018_v10, %v727_v17 }
 0x2cd   :  { %v1005_v58 = vpop.f32.mrf.mxu2 }
 0x2d0   :  { %v979_v63 = vpop.f32.mrf.mxu3 }
 0x2d1   :  { %v994_v0 = vpop.f32.mrf.mxu0  ;;  %v980_v18 = vadd.f32 %v979_v63, %v726_v12 }
 0x2d2   :  { %v1020_v3 = vpop.f32.mrf.mxu1 }
 0x2d3   :  { %v993_v24 = vadd.f32 %v992_v54, %v980_v18 }
 0x2d5   :  { %v1007_v7 = vpop.f32.mrf.mxu2  ;;  %v1006_v32 = vadd.f32 %v1005_v58, %v993_v24  ;;  %v2171_v58 = vld [vmem:[%s2652_s9 + $0x38] sm:$0xff] }
 0x2d6   :  { %1560 = vmatpush.bf16.msrb.mxu2 %v2171_v58  ;;  %v2169_v7 = vld [vmem:[%s2652_s9 + $0x28] sm:$0xff] }
 0x2d7   :  { %v1048_v44 = vmax.f32 %v1006_v32, 0.0 }
 0x2d8   :  { %v981_v15 = vpop.f32.mrf.mxu3 }
 0x2da   :  { %v1044_v11 = vpop.f32.mrf.mxu0  ;;  %1561 = vmatpush.bf16.msrb.mxu2 %v2170_v1 }
 0x2de   :  { %1562 = vmatpush.bf16.msrb.mxu2 %v2169_v7 }
 0x2e0   :  { %v1031_v27 = vpop.f32.mrf.mxu3 }
 0x2e1   :  { %v1032_v28 = vadd.f32 %v1031_v27, %v1019_v23 }
 0x2e2   :  { %v1046_v29 = vpop.f32.mrf.mxu0 }
 0x2e3   :  { %v1045_v33 = vadd.f32 %v1044_v11, %v1032_v28 }
 0x2e5   :  { %v1049_v36 = vmax.f32 %v1045_v33, 0.0 }
 0x2e7   :  { %v1052_v39 = vrot.slane %v1049_v36, 6 }
 0x2e8   :  { %v1033_v45 = vpop.f32.mrf.mxu3 }
 0x2e9   :  { %v1053_v42 = vsel %vm563_vm15, %v1048_v44, %v1052_v39  ;;  %v1055_v43 = vsel %vm1054_vm1, %v1048_v44, %v1052_v39  ;;  %v1058_v46 = vsel %vm1057_vm3, %v1048_v44, %v1052_v39  ;;  %v1061_v50 = vsel %vm1060_vm4, %v1052_v39, %v1048_v44 }
 0x2ea   :  { %v1056_v49 = vrot.slane %v1055_v43, 2  ;;  %1063 = vst [vmem:[#allocation1] ss:$4 sm:$0xff] %v1053_v42  ;;  %v1059_v47 = vrot.slane %v1058_v46, 4  ;;  %v1062_v54 = vrot.slane %v1061_v50, 6 }
 0x2ec   :  { %1067 = vst [vmem:[#allocation1 + $0x20] ss:$4 sm:$0xff] %v1056_v49 }
 0x2f1   :  { %v1064_v52 = vld.sshfl [vmem:[#allocation1] sm:$0xff pattern:$0x73625140]  ;;  %v1065_v53 = vld.sshfl [vmem:[#allocation1 + $0x8] sm:$0xff pattern:$0x73625140] }
 0x2f2   :  { %1070 = vst [vmem:[#allocation1] ss:$4 sm:$0xff] %v1059_v47  ;;  %v1084_v10 = vsel %vm563_vm15, %v1064_v52, -inf  ;;  %v1091_v40 = vsel %vm563_vm15, %v1065_v53, -inf }
 0x2f3   :  { %v1085_v55 = vrot.slane %v1084_v10, 4  ;;  %v1092_v56 = vrot.slane %v1091_v40, 4  ;;  %v1068_v57 = vld.sshfl [vmem:[#allocation1 + $0x20] sm:$0xff pattern:$0x73625140] }
 0x2f4   :  { %v1069_v59 = vld.sshfl [vmem:[#allocation1 + $0x28] sm:$0xff pattern:$0x73625140]  ;;  %v1098_v60 = vsel %vm563_vm15, %v1068_v57, -inf }
 0x2f5   :  { %v1086_v61 = vmax.f32 %v1084_v10, %v1085_v55  ;;  %v1093_v62 = vmax.f32 %v1091_v40, %v1092_v56  ;;  %1073 = vst [vmem:[#allocation1 + $0x20] ss:$4 sm:$0xff] %v1062_v54  ;;  %v1099_v63 = vrot.slane %v1098_v60, 4  ;;  %v1105_v0 = vsel %vm563_vm15, %v1069_v59, -inf }
 0x2f6   :  { %v1106_v2 = vrot.slane %v1105_v0, 4 }
 0x2f7   :  { %v1087_v3 = vrot.slane %v1086_v61, 2  ;;  %v1094_v4 = vrot.slane %v1093_v62, 2  ;;  %v1100_v5 = vmax.f32 %v1098_v60, %v1099_v63 }
 0x2f8   :  { %v1107_v6 = vmax.f32 %v1105_v0, %v1106_v2 }
 0x2f9   :  { %v1071_v8 = vld.sshfl [vmem:[#allocation1] sm:$0xff pattern:$0x73625140]  ;;  %v1088_v9 = vmax.f32 %v1086_v61, %v1087_v3  ;;  %v1072_v12 = vld.sshfl [vmem:[#allocation1 + $0x8] sm:$0xff pattern:$0x73625140]  ;;  %v1095_v14 = vmax.f32 %v1093_v62, %v1094_v4 }
 0x2fa   :  { %v1112_v13 = vsel %vm563_vm15, %v1071_v8, -inf  ;;  %v1119_v15 = vsel %vm563_vm15, %v1072_v12, -inf  ;;  %v1101_v11 = vrot.slane %v1100_v5, 2  ;;  %v1108_v51 = vrot.slane %v1107_v6, 2 }
 0x2fb   :  { %v1113_v16 = vrot.slane %v1112_v13, 4  ;;  %v1120_v17 = vrot.slane %v1119_v15, 4  ;;  %v1089_v20 = vrot.slane %v1088_v9, 1  ;;  %v1096_v22 = vrot.slane %v1095_v14, 1 }
 0x2fc   :  { %v1074_v18 = vld.sshfl [vmem:[#allocation1 + $0x20] sm:$0xff pattern:$0x73625140]  ;;  %v1075_v19 = vld.sshfl [vmem:[#allocation1 + $0x28] sm:$0xff pattern:$0x73625140]  ;;  %v1102_v24 = vmax.f32 %v1100_v5, %v1101_v11  ;;  %v1109_v26 = vmax.f32 %v1107_v6, %v1108_v51 }
 0x2fd   :  { %v1114_v21 = vmax.f32 %v1112_v13, %v1113_v16  ;;  %v1121_v23 = vmax.f32 %v1119_v15, %v1120_v17  ;;  %v1126_v25 = vsel %vm563_vm15, %v1074_v18, -inf  ;;  %v1133_v27 = vsel %vm563_vm15, %v1075_v19, -inf  ;;  %v2168_v11 = vld [vmem:[%s2652_s9 + $0x20] sm:$0xff]  ;;  %v2167_v51 = vld [vmem:[%s2652_s9 + $0x18] sm:$0xff]  ;;  %v2166_v16 = vld [vmem:[%s2652_s9 + $0x10] sm:$0xff] }
 0x2fe   :  { %v1127_v30 = vrot.slane %v1126_v25, 4  ;;  %v1134_v31 = vrot.slane %v1133_v27, 4  ;;  %v1090_v32 = vmax.f32 %v1088_v9, %v1089_v20  ;;  %v1097_v34 = vmax.f32 %v1095_v14, %v1096_v22  ;;  %1563 = vmatpush.bf16.msrb.mxu2 %v2168_v11  ;;  %v2165_v17 = vld [vmem:[%s2652_s9 + $0x8] sm:$0xff]  ;;  %v2175_v18 = vld [vmem:[%s2654_s11 + $0x18] sm:$0xff]  ;;  %v2164_v19 = vld [vmem:[%s2652_s9] sm:$0xff] }
 0x2ff   :  { %v1115_v28 = vrot.slane %v1114_v21, 2  ;;  %v1122_v29 = vrot.slane %v1121_v23, 2  ;;  %v1103_v36 = vrot.slane %v1102_v24, 1  ;;  %v1110_v38 = vrot.slane %v1109_v26, 1  ;;  %1618 = vmatpush.bf16.msrb.mxu1 %v2175_v18  ;;  %v2174_v20 = vld [vmem:[%s2654_s11 + $0x10] sm:$0xff] }
 0x300   :  { %v1128_v37 = vmax.f32 %v1126_v25, %v1127_v30  ;;  %v1135_v44 = vmax.f32 %v1133_v27, %v1134_v31  ;;  %v1140_v43 = vpack.c.bf16 %v1090_v32, %v1090_v32  ;;  %v1141_v46 = vpack.c.bf16 %v1097_v34, %v1097_v34  ;;  %v2213_v30 = vld [vmem:[%s2651_s8] ss:$0 sm:$0xff] }
 0x301   :  { %v1116_v33 = vmax.f32 %v1114_v21, %v1115_v28  ;;  %v1123_v35 = vmax.f32 %v1121_v23, %v1122_v29  ;;  %v1104_v50 = vmax.f32 %v1102_v24, %v1103_v36  ;;  %v1111_v52 = vmax.f32 %v1109_v26, %v1110_v38  ;;  %v2173_v21 = vld [vmem:[%s2654_s11 + $0x8] sm:$0xff]  ;;  %v2214_v38 = vld [vmem:[%s2653_s10] ss:$0 sm:$0xff] }
 0x302   :  { %v1129_v48 = vrot.slane %v1128_v37, 2  ;;  %v1136_v45 = vrot.slane %v1135_v44, 2  ;;  %v1353_v56 = vunpack.c.l.b16 %v1140_v43  ;;  %v1354_v58 = vunpack.c.l.b16 %v1141_v46  ;;  %1564 = vmatpush.bf16.msrb.mxu2 %v2167_v51 }
 0x303   :  { %v1117_v39 = vrot.slane %v1116_v33, 1  ;;  %v1124_v41 = vrot.slane %v1123_v35, 1  ;;  %v1176_v61 = vpack.c.bf16 %v1104_v50, %v1104_v50  ;;  %v1177_v63 = vpack.c.bf16 %v1111_v52, %v1111_v52  ;;  %1619 = vmatpush.bf16.msrb.mxu1 %v2174_v20 }
 0x304   :  { %v1130_v47 = vmax.f32 %v1128_v37, %v1129_v48  ;;  %v1137_v53 = vmax.f32 %v1135_v44, %v1136_v45  ;;  %v2172_v37 = vld [vmem:[%s2654_s11] sm:$0xff] }
 0x305   :  { %v1118_v42 = vmax.f32 %v1116_v33, %v1117_v39  ;;  %v1125_v49 = vmax.f32 %v1123_v35, %v1124_v41  ;;  %v1217_v6 = vunpack.c.l.b16 %v1176_v61  ;;  %v1218_v8 = vunpack.c.l.b16 %v1177_v63 }
 0x306   :  { %v1131_v40 = vrot.slane %v1130_v47, 1  ;;  %v1138_v55 = vrot.slane %v1137_v53, 1  ;;  %1565 = vmatpush.bf16.msrb.mxu2 %v2166_v16 }
 0x307   :  { %v1142_v54 = vpack.c.bf16 %v1118_v42, %v1118_v42  ;;  %v1143_v10 = vpack.c.bf16 %v1125_v49, %v1125_v49  ;;  %1620 = vmatpush.bf16.msrb.mxu1 %v2173_v21  ;;  %v2215_v42 = vld [vmem:[%s2655_s12] ss:$0 sm:$0xff] }
 0x308   :  { %v1132_v60 = vmax.f32 %v1130_v47, %v1131_v40  ;;  %v1139_v62 = vmax.f32 %v1137_v53, %v1138_v55 }
 0x309   :  { %v1355_v57 = vunpack.c.l.b16 %v1142_v54  ;;  %v1356_v59 = vunpack.c.l.b16 %v1143_v10 }
 0x30a   :  { %v1178_v4 = vpack.c.bf16 %v1132_v60, %v1132_v60  ;;  %v1179_v5 = vpack.c.bf16 %v1139_v62, %v1139_v62  ;;  %1566 = vmatpush.bf16.msrb.mxu2 %v2165_v17 }
 0x30b   :  { %v1357_v0 = vsel %vm374_vm7, %v1355_v57, %v1353_v56  ;;  %v1358_v1 = vsel %vm374_vm7, %v1356_v59, %v1354_v58  ;;  %1621 = vmatpush.bf16.msrb.mxu1 %v2172_v37 }
 0x30c   :  { %v1359_v2 = vpack.c.b16 %v1357_v0, %v1357_v0  ;;  %v1360_v3 = vpack.c.b16 %v1358_v1, %v1358_v1  ;;  %v1219_v7 = vunpack.c.l.b16 %v1178_v4  ;;  %v1220_v9 = vunpack.c.l.b16 %v1179_v5 }
 0x30e   :  { %1467 = vmatmul.bf16.vlgmr.msra.gmra.mxu3 %v1359_v2  ;;  %1480 = vmatmul.bf16.vlgmr.msrb.gmra.mxu0 %v1360_v3  ;;  %v1221_v12 = vsel %vm374_vm7, %v1219_v7, %v1217_v6  ;;  %v1222_v14 = vsel %vm374_vm7, %v1220_v9, %v1218_v8 }
 0x30f   :  { %v1223_v13 = vpack.c.b16 %v1221_v12, %v1221_v12  ;;  %v1224_v15 = vpack.c.b16 %v1222_v14, %v1222_v14  ;;  %1567 = vmatpush.bf16.msrb.mxu2 %v2164_v19 }
 0x311   :  { %1331 = vmatmul.bf16.vlgmr.msra.gmra.mxu2 %v1223_v13  ;;  %1344 = vmatmul.bf16.vlgmr.msra.gmra.mxu1 %v1224_v15 }
 0x38b   :  { %v1481_v22 = vpop.f32.mrf.mxu0 }
 0x38e   :  { %v1345_v23 = vpop.f32.mrf.mxu1 }
 0x391   :  { %v1468_v24 = vpop.f32.mrf.mxu3 }
 0x393   :  { %v1483_v25 = vpop.f32.mrf.mxu0 }
 0x394   :  { %v1332_v26 = vpop.f32.mrf.mxu2 }
 0x395   :  { %v1346_v27 = vadd.f32 %v1345_v23, %v1332_v26 }
 0x396   :  { %v1347_v28 = vpop.f32.mrf.mxu1 }
 0x397   :  { %v1469_v29 = vadd.f32 %v1468_v24, %v1346_v27 }
 0x399   :  { %v1470_v31 = vpop.f32.mrf.mxu3  ;;  %v1482_v32 = vadd.f32 %v1481_v22, %v1469_v29 }
 0x39b   :  { %v1489_v33 = vadd.f32 %v2213_v30, %v1482_v32 }
 0x39c   :  { %v1334_v34 = vpop.f32.mrf.mxu2 }
 0x39d   :  { %v1490_v35 = vmax.f32 %v1489_v33, 0.0 }
 0x39f   :  { %v1491_v36 = vpack.c.bf16 %v1490_v35, %v1490_v35 }
 0x3a1   :  { %1568 = vmatmul.bf16.vlgmr.msrb.gmra.mxu2 %v1491_v36 }
 0x424   :  { %v1569_v44 = vpop.f32.mrf.mxu2 }
 0x425   :  { %v1570_v39 = vadd.f32 %v2214_v38, %v1569_v44 }
 0x427   :  { %v1573_v41 = vmax.f32 %v1570_v39, 0.0 }
 0x429   :  { %v1574_v48 = vpack.c.bf16 %v1573_v41, %v1573_v41 }
 0x42b   :  { %2070 = vmatmul.msk.bf16.vlgmr.msrb.gmra.mxu1 %vm411_vm14, %v1574_v48 }
 0x42c   :  { %v1571_v45 = vpop.f32.mrf.mxu2 }
 0x4a8   :  { %v1623_v43 = vpop.f32.mrf.mxu1 }
 0x4a9   :  { %v1624_v49 = vadd.f32 %v2215_v42, %v1623_v43 }
 0x4ab   :  { %1628 = vst.msk [vmem:[#allocation7] sm:$0x3] %vm1627_vm5, %v1624_v49 }
 0x4ac   :  { %1639 = dma.vmem_to_hbm [thread:$0]  %s1635_s5, 32, %s1637_s7, [#allocation4]  }
 0x4b0   :  { %v1625_v46 = vpop.f32.mrf.mxu1 }
 0x4b1   :  { %2292 = dma.done.wait [#allocation4], 32  }
 0x4b2   :  { %2293 = vsyncadd [#allocation4], 4294967264 }
 0x4b3   :  { %1644 = vsyncpa [#allocation3], 1 }
 0x4b4   :  { %1645 = vsyncpa [#allocation6], 1 }
 0x4b5   :  { %1646 = vsyncpa [#allocation4], 1 }

</bundles_post_ra>
